<compile_context>
chip_gen: v6e
topology: v6e:2x2x1
jax: 0.10.0
libtpu: 0.0.40
codegen_flags: <defaults>
</compile_context>

<pallas_src>
import math
import numpy as np
import jax
import jax.numpy as jnp
from jax import lax
from jax.experimental import pallas as pl
from jax.experimental.pallas import tpu as pltpu


# =============================================================================
# p4m group-structure parameter glue (mirrors PyTorch `indices` / `transform`)
# =============================================================================
def p4m_indices(weight_shape):
    """Replicates indices('p4m', weight_shape) from the PyTorch module."""
    n, f, k1, k2 = weight_shape
    idx = np.arange(8).reshape(4, 2)
    idx = np.tile(idx.reshape(1, 1, 1, 4, 2), (4, 2, 1, 1, 1))      # (4,2,1,4,2)
    idx[:, 1] = np.roll(idx[:, 1], 1, axis=3)
    for r in (1, 2, 3):
        idx[r, 0, :, :, 0] = np.roll(idx[r, 0, :, :, 0], 1, axis=1)
        idx[r, 0, :, :, 1] = np.roll(idx[r, 0, :, :, 1], -1, axis=1)
    for r in (1, 2, 3):
        idx[r, 1, :, :, 0] = np.roll(idx[r, 0, :, :, 0], -1, axis=1)
        idx[r, 1, :, :, 1] = np.roll(idx[r, 0, :, :, 1], 1, axis=1)
    idx = idx.reshape(8, 1, 8, 1)
    idx = np.broadcast_to(idx[..., None, None], (8, n, 8, f // 8, k1, k2))
    return jnp.asarray(np.ascontiguousarray(idx), dtype=jnp.int32)


def transform(W, b, first=False):
    """Replicates transform(W, b, rot=True, mirror=True, first=first)."""
    n, f, k1, k2 = W.shape
    if not first:
        Wr = W.reshape(1, 1, n, 4, 2, f // 8, k1, k2)
        Wr = jnp.concatenate([jnp.rot90(Wr, r, axes=(6, 7)) for r in range(4)], axis=0)
        Wr = jnp.concatenate([Wr, jnp.flip(Wr, axis=-1)], axis=1)
        Wr = Wr.reshape(8, n, 8, f // 8, k1, k2)
        idx = p4m_indices((n, f, k1, k2))
        Wr = jnp.take_along_axis(Wr, idx, axis=2)
    else:
        Wr = W.reshape(1, 1, n, f, k1, k2)
        Wr = jnp.concatenate([jnp.rot90(Wr, r, axes=(4, 5)) for r in range(4)], axis=0)
        Wr = jnp.concatenate([Wr, jnp.flip(Wr, axis=-1)], axis=1)
    W_out = Wr.reshape(-1, f, k1, k2)
    b_out = jnp.broadcast_to(b, (4, 2, n)).reshape(-1)
    return W_out, b_out


# =============================================================================
# Pallas conv2d ("same" padding, stride 1) as a single fused matmul per block
# =============================================================================
def _round_up(x, m):
    return (x + m - 1) // m * m


def _make_conv_kernel(K, H, W, Cin, KK_Cin, KPAD, CPAD):
    def kernel(x_ref, w_ref, o_ref, lhs_ref):
        # x_ref : (B, Hp, Wp, Cin)   spatially pre-padded NHWC input block
        # w_ref : (KPAD, CPAD)       packed weights (+ bias row at KK_Cin)
        # o_ref : (B, H, W, CPAD)    lane-dense output block
        # lhs_ref: (B, H, W, KPAD)   VMEM im2col scratch
        B = o_ref.shape[0]

        # Tail of the fused contraction dim: ones column (bias) + zero padding.
        # (Written every step: cheap, and robust when the parallel grid is
        #  split across TensorCores, where per-core scratch starts cold.)
        tail_w = KPAD - KK_Cin
        col = lax.broadcasted_iota(jnp.int32, (B, H, W, tail_w), 3)
        lhs_ref[:, :, :, KK_Cin:] = jnp.where(col == 0, 1.0, 0.0).astype(lhs_ref.dtype)

        # im2col: each (kh, kw) tap window lands in its own column band.
        for kh in range(K):
            for kw in range(K):
                t = kh * K + kw
                lhs_ref[:, :, :, t * Cin:(t + 1) * Cin] = (
                    x_ref[:, kh:kh + H, kw:kw + W, :].astype(lhs_ref.dtype))

        # One fused MXU matmul (contraction depth KPAD, lane-dense output),
        # bias already folded in via the ones column / bias row.
        lhs = lhs_ref[...].reshape(B * H * W, KPAD)
        out = jnp.dot(lhs, w_ref[...], preferred_element_type=jnp.float32)
        o_ref[...] = out.reshape(B, H, W, CPAD).astype(o_ref.dtype)

    return kernel


def conv2d_same_pallas(x_nchw, w_oihw, b, *, compute_dtype=None, batch_tile=None):
    N, Cin, H, W = x_nchw.shape
    Cout, Cin2, K, K2 = w_oihw.shape
    assert Cin2 == Cin and K2 == K
    out_dtype = x_nchw.dtype
    if compute_dtype is None:
        compute_dtype = x_nchw.dtype

    pad = (K - 1) // 2
    Hp, Wp = H + 2 * pad, W + 2 * pad
    KK_Cin = K * K * Cin
    KPAD = _round_up(KK_Cin + 1, 128)     # +1 row for the fused bias
    CPAD = _round_up(Cout, 128)           # lane-dense output channels

    # NHWC, spatially pre-padded ("same" conv, stride 1).
    # TODO(synk): for large images, handle the halo inside the kernel
    # (H-tiled blocks + masked edge taps / manual halo DMA, plus an explicit
    # vmem_limit_bytes) instead of materializing a padded copy in HBM.
    x = jnp.transpose(x_nchw, (0, 2, 3, 1)).astype(compute_dtype)
    x = jnp.pad(x, ((0, 0), (pad, pad), (pad, pad), (0, 0)))

    # Pack expanded weights as one (KPAD, CPAD) RHS, bias folded in at row KK_Cin.
    w_hwio = jnp.transpose(w_oihw, (2, 3, 1, 0)).reshape(KK_Cin, Cout)
    w_packed = jnp.zeros((KPAD, CPAD), jnp.float32)
    w_packed = w_packed.at[:KK_Cin, :Cout].set(w_hwio)
    w_packed = w_packed.at[KK_Cin, :Cout].set(b)
    w_packed = w_packed.astype(compute_dtype)

    if batch_tile is None:
        # Fold batch into the matmul M dimension, but keep >= 2 parallel grid
        # steps when possible so both TensorCores get work on megacore parts.
        batch_tile = N // 2 if (N % 2 == 0 and N > 2) else 1
    assert N % batch_tile == 0, "batch_tile must divide N"
    NB = N // batch_tile

    kernel = _make_conv_kernel(K, H, W, Cin, KK_Cin, KPAD, CPAD)
    out = pl.pallas_call(
        kernel,
        out_shape=jax.ShapeDtypeStruct((N, H, W, CPAD), out_dtype),
        grid_spec=pltpu.PrefetchScalarGridSpec(
            num_scalar_prefetch=0,
            grid=(NB,),
            in_specs=[
                pl.BlockSpec((batch_tile, Hp, Wp, Cin), lambda n: (n, 0, 0, 0)),
                pl.BlockSpec((KPAD, CPAD), lambda n: (0, 0)),
            ],
            out_specs=pl.BlockSpec((batch_tile, H, W, CPAD), lambda n: (n, 0, 0, 0)),
            scratch_shapes=[pltpu.VMEM((batch_tile, H, W, KPAD), compute_dtype)],
        ),
        compiler_params=pltpu.CompilerParams(dimension_semantics=("parallel",)),
    )(x, w_packed)

    # Drop the channel padding and return to NCHW.
    return jnp.transpose(out[..., :Cout], (0, 3, 1, 2)).astype(out_dtype)


# =============================================================================
# Module wrapper (mirrors adaptable_symmetric_2D_conv)
# =============================================================================
class AdaptableSymmetric2DConv:
    def __init__(self, in_channels, out_channels, kernel_size, rot_group,
                 mirror_group, first=False, key=None):
        self.in_channels = in_channels
        self.out_channels = out_channels
        self.kernel_size = kernel_size
        self.rot_group = rot_group
        self.mirror_group = mirror_group
        self.first = first
        self.padding = (kernel_size - 1) // 2
        # deterministic init mirroring kaiming_uniform_(a=sqrt(5)) bounds
        fan_in = in_channels * kernel_size * kernel_size
        bound = 1.0 / math.sqrt(fan_in)
        kw, kb = jax.random.split(key)
        self.W = jax.random.uniform(
            kw, (out_channels, in_channels, kernel_size, kernel_size),
            jnp.float32, -bound, bound)
        self.b = jax.random.uniform(kb, (out_channels,), jnp.float32, -bound, bound)

    def _params(self):
        if self.rot_group != 'none':
            return transform(self.W, self.b, first=self.first)
        return self.W, self.b

    def __call__(self, x, compute_dtype=None):
        W, b = self._params()
        return conv2d_same_pallas(x, W, b, compute_dtype=compute_dtype)

    def reference(self, x):
        """Pure-JAX reference (XLA conv) for correctness checking."""
        W, b = self._params()
        y = lax.conv_general_dilated(
            x, W, window_strides=(1, 1),
            padding=[(self.padding, self.padding)] * 2,
            dimension_numbers=('NCHW', 'OIHW', 'NCHW'),
            precision=lax.Precision.HIGHEST)
        return y + b[None, :, None, None]


if __name__ == "__main__":
    key = jax.random.PRNGKey(0)
    k1, k2, k3, k4 = jax.random.split(key, 4)

    # --- first=True ("lifting" layer): plain image input (NCHW) ---
    m_first = AdaptableSymmetric2DConv(4, 4, 3, 'p4m', 'm', first=True, key=k1)
    x_first = jax.random.normal(k3, (2, 4, 16, 16), jnp.float32)
    y_first = m_first(x_first)
    jax.block_until_ready(y_first)
    assert y_first.shape == (2, 32, 16, 16)
    np.testing.assert_allclose(np.asarray(y_first), np.asarray(m_first.reference(x_first)),
                               rtol=1e-4, atol=1e-4)

    # --- first=False (deep layer): group-structured input, Cin multiple of 8 ---
    m_deep = AdaptableSymmetric2DConv(8, 4, 3, 'p4m', 'm', first=False, key=k2)
    x_deep = jax.random.normal(k4, (2, 8, 16, 16), jnp.float32)
    y_deep = m_deep(x_deep)
    jax.block_until_ready(y_deep)
    assert y_deep.shape == (2, 32, 16, 16)
    np.testing.assert_allclose(np.asarray(y_deep), np.asarray(m_deep.reference(x_deep)),
                               rtol=1e-4, atol=1e-4)

    # --- bf16 operand fast path (v6e/v7x MXU), f32 accumulation retained ---
    y_bf16 = m_deep(x_deep, compute_dtype=jnp.bfloat16)
    jax.block_until_ready(y_bf16)
    assert y_bf16.shape == (2, 32, 16, 16)
    np.testing.assert_allclose(np.asarray(y_bf16), np.asarray(m_deep.reference(x_deep)),
                               rtol=5e-2, atol=5e-2)

    print("KERNEL_OK")
</pallas_src>

<mosaic_0001>
module attributes {stable_mosaic.version = 11 : i64} {
  func.func @kernel(%arg0: i32, %arg1: memref<1x18x18x4xf32, #tpu.memory_space<vmem>>, %arg2: memref<128x128xf32, #tpu.memory_space<vmem>>, %arg3: memref<1x16x16x128xf32, #tpu.memory_space<vmem>>, %arg4: memref<1x16x16x128xf32, #tpu.memory_space<vmem>>) attributes {dimension_semantics = [#tpu.dimension_semantics<parallel>], iteration_bounds = array<i64: 2>, scalar_prefetch = 0 : i64, scratch_operands = 1 : i64, tpu.core_type = #tpu.core_type<tc>, window_params = [{transform_indices = @transform_0, window_bounds = array<i64: 1, 18, 18, 4>}, {pipeline_mode = #tpu.pipeline_mode<synchronous>, transform_indices = @transform_1, window_bounds = array<i64: 128, 128>}, {transform_indices = @transform_2, window_bounds = array<i64: 1, 16, 16, 128>}]} {
    %0 = tpu.iota {dimensions = array<i32: 3>} : vector<1x16x16x92xi32>
    %c0_i32 = arith.constant 0 : i32
    %1 = vector.broadcast %c0_i32 : i32 to vector<1x16x16x92xi32>
    %2 = arith.cmpi eq, %0, %1 : vector<1x16x16x92xi32>
    %cst = arith.constant 1.000000e+00 : f32
    %cst_0 = arith.constant 0.000000e+00 : f32
    %3 = vector.broadcast %cst : f32 to vector<1x16x16x92xf32>
    %4 = vector.broadcast %cst_0 : f32 to vector<1x16x16x92xf32>
    %5 = arith.select %2, %3, %4 : vector<1x16x16x92xi1>, vector<1x16x16x92xf32>
    %c0 = arith.constant 0 : index
    %c0_1 = arith.constant 0 : index
    %c0_2 = arith.constant 0 : index
    %c36 = arith.constant 36 : index
    %6 = vector.load %arg4[%c0, %c0_1, %c0_2, %c36] : memref<1x16x16x128xf32, #tpu.memory_space<vmem>>, vector<1x16x16x92xf32>
    tpu.vector_store %arg4[%c0, %c0_1, %c0_2, %c36], %5 {strides = array<i32>} : memref<1x16x16x128xf32, #tpu.memory_space<vmem>>, vector<1x16x16x92xf32>,
    %c0_3 = arith.constant 0 : index
    %c0_4 = arith.constant 0 : index
    %c0_5 = arith.constant 0 : index
    %c0_6 = arith.constant 0 : index
    %7 = vector.load %arg1[%c0_3, %c0_4, %c0_5, %c0_6] : memref<1x18x18x4xf32, #tpu.memory_space<vmem>>, vector<1x16x16x4xf32>
    %c0_7 = arith.constant 0 : index
    %c0_8 = arith.constant 0 : index
    %c0_9 = arith.constant 0 : index
    %c0_10 = arith.constant 0 : index
    %8 = vector.load %arg4[%c0_7, %c0_8, %c0_9, %c0_10] : memref<1x16x16x128xf32, #tpu.memory_space<vmem>>, vector<1x16x16x4xf32>
    tpu.vector_store %arg4[%c0_7, %c0_8, %c0_9, %c0_10], %7 {strides = array<i32>} : memref<1x16x16x128xf32, #tpu.memory_space<vmem>>, vector<1x16x16x4xf32>,
    %c0_11 = arith.constant 0 : index
    %c0_12 = arith.constant 0 : index
    %c1 = arith.constant 1 : index
    %c0_13 = arith.constant 0 : index
    %9 = vector.load %arg1[%c0_11, %c0_12, %c1, %c0_13] : memref<1x18x18x4xf32, #tpu.memory_space<vmem>>, vector<1x16x16x4xf32>
    %c0_14 = arith.constant 0 : index
    %c0_15 = arith.constant 0 : index
    %c0_16 = arith.constant 0 : index
    %c4 = arith.constant 4 : index
    %10 = vector.load %arg4[%c0_14, %c0_15, %c0_16, %c4] : memref<1x16x16x128xf32, #tpu.memory_space<vmem>>, vector<1x16x16x4xf32>
    tpu.vector_store %arg4[%c0_14, %c0_15, %c0_16, %c4], %9 {strides = array<i32>} : memref<1x16x16x128xf32, #tpu.memory_space<vmem>>, vector<1x16x16x4xf32>,
    %c0_17 = arith.constant 0 : index
    %c0_18 = arith.constant 0 : index
    %c2 = arith.constant 2 : index
    %c0_19 = arith.constant 0 : index
    %11 = vector.load %arg1[%c0_17, %c0_18, %c2, %c0_19] : memref<1x18x18x4xf32, #tpu.memory_space<vmem>>, vector<1x16x16x4xf32>
    %c0_20 = arith.constant 0 : index
    %c0_21 = arith.constant 0 : index
    %c0_22 = arith.constant 0 : index
    %c8 = arith.constant 8 : index
    %12 = vector.load %arg4[%c0_20, %c0_21, %c0_22, %c8] : memref<1x16x16x128xf32, #tpu.memory_space<vmem>>, vector<1x16x16x4xf32>
    tpu.vector_store %arg4[%c0_20, %c0_21, %c0_22, %c8], %11 {strides = array<i32>} : memref<1x16x16x128xf32, #tpu.memory_space<vmem>>, vector<1x16x16x4xf32>,
    %c0_23 = arith.constant 0 : index
    %c1_24 = arith.constant 1 : index
    %c0_25 = arith.constant 0 : index
    %c0_26 = arith.constant 0 : index
    %13 = vector.load %arg1[%c0_23, %c1_24, %c0_25, %c0_26] : memref<1x18x18x4xf32, #tpu.memory_space<vmem>>, vector<1x16x16x4xf32>
    %c0_27 = arith.constant 0 : index
    %c0_28 = arith.constant 0 : index
    %c0_29 = arith.constant 0 : index
    %c12 = arith.constant 12 : index
    %14 = vector.load %arg4[%c0_27, %c0_28, %c0_29, %c12] : memref<1x16x16x128xf32, #tpu.memory_space<vmem>>, vector<1x16x16x4xf32>
    tpu.vector_store %arg4[%c0_27, %c0_28, %c0_29, %c12], %13 {strides = array<i32>} : memref<1x16x16x128xf32, #tpu.memory_space<vmem>>, vector<1x16x16x4xf32>,
    %c0_30 = arith.constant 0 : index
    %c1_31 = arith.constant 1 : index
    %c1_32 = arith.constant 1 : index
    %c0_33 = arith.constant 0 : index
    %15 = vector.load %arg1[%c0_30, %c1_31, %c1_32, %c0_33] : memref<1x18x18x4xf32, #tpu.memory_space<vmem>>, vector<1x16x16x4xf32>
    %c0_34 = arith.constant 0 : index
    %c0_35 = arith.constant 0 : index
    %c0_36 = arith.constant 0 : index
    %c16 = arith.constant 16 : index
    %16 = vector.load %arg4[%c0_34, %c0_35, %c0_36, %c16] : memref<1x16x16x128xf32, #tpu.memory_space<vmem>>, vector<1x16x16x4xf32>
    tpu.vector_store %arg4[%c0_34, %c0_35, %c0_36, %c16], %15 {strides = array<i32>} : memref<1x16x16x128xf32, #tpu.memory_space<vmem>>, vector<1x16x16x4xf32>,
    %c0_37 = arith.constant 0 : index
    %c1_38 = arith.constant 1 : index
    %c2_39 = arith.constant 2 : index
    %c0_40 = arith.constant 0 : index
    %17 = vector.load %arg1[%c0_37, %c1_38, %c2_39, %c0_40] : memref<1x18x18x4xf32, #tpu.memory_space<vmem>>, vector<1x16x16x4xf32>
    %c0_41 = arith.constant 0 : index
    %c0_42 = arith.constant 0 : index
    %c0_43 = arith.constant 0 : index
    %c20 = arith.constant 20 : index
    %18 = vector.load %arg4[%c0_41, %c0_42, %c0_43, %c20] : memref<1x16x16x128xf32, #tpu.memory_space<vmem>>, vector<1x16x16x4xf32>
    tpu.vector_store %arg4[%c0_41, %c0_42, %c0_43, %c20], %17 {strides = array<i32>} : memref<1x16x16x128xf32, #tpu.memory_space<vmem>>, vector<1x16x16x4xf32>,
    %c0_44 = arith.constant 0 : index
    %c2_45 = arith.constant 2 : index
    %c0_46 = arith.constant 0 : index
    %c0_47 = arith.constant 0 : index
    %19 = vector.load %arg1[%c0_44, %c2_45, %c0_46, %c0_47] : memref<1x18x18x4xf32, #tpu.memory_space<vmem>>, vector<1x16x16x4xf32>
    %c0_48 = arith.constant 0 : index
    %c0_49 = arith.constant 0 : index
    %c0_50 = arith.constant 0 : index
    %c24 = arith.constant 24 : index
    %20 = vector.load %arg4[%c0_48, %c0_49, %c0_50, %c24] : memref<1x16x16x128xf32, #tpu.memory_space<vmem>>, vector<1x16x16x4xf32>
    tpu.vector_store %arg4[%c0_48, %c0_49, %c0_50, %c24], %19 {strides = array<i32>} : memref<1x16x16x128xf32, #tpu.memory_space<vmem>>, vector<1x16x16x4xf32>,
    %c0_51 = arith.constant 0 : index
    %c2_52 = arith.constant 2 : index
    %c1_53 = arith.constant 1 : index
    %c0_54 = arith.constant 0 : index
    %21 = vector.load %arg1[%c0_51, %c2_52, %c1_53, %c0_54] : memref<1x18x18x4xf32, #tpu.memory_space<vmem>>, vector<1x16x16x4xf32>
    %c0_55 = arith.constant 0 : index
    %c0_56 = arith.constant 0 : index
    %c0_57 = arith.constant 0 : index
    %c28 = arith.constant 28 : index
    %22 = vector.load %arg4[%c0_55, %c0_56, %c0_57, %c28] : memref<1x16x16x128xf32, #tpu.memory_space<vmem>>, vector<1x16x16x4xf32>
    tpu.vector_store %arg4[%c0_55, %c0_56, %c0_57, %c28], %21 {strides = array<i32>} : memref<1x16x16x128xf32, #tpu.memory_space<vmem>>, vector<1x16x16x4xf32>,
    %c0_58 = arith.constant 0 : index
    %c2_59 = arith.constant 2 : index
    %c2_60 = arith.constant 2 : index
    %c0_61 = arith.constant 0 : index
    %23 = vector.load %arg1[%c0_58, %c2_59, %c2_60, %c0_61] : memref<1x18x18x4xf32, #tpu.memory_space<vmem>>, vector<1x16x16x4xf32>
    %c0_62 = arith.constant 0 : index
    %c0_63 = arith.constant 0 : index
    %c0_64 = arith.constant 0 : index
    %c32 = arith.constant 32 : index
    %24 = vector.load %arg4[%c0_62, %c0_63, %c0_64, %c32] : memref<1x16x16x128xf32, #tpu.memory_space<vmem>>, vector<1x16x16x4xf32>
    tpu.vector_store %arg4[%c0_62, %c0_63, %c0_64, %c32], %23 {strides = array<i32>} : memref<1x16x16x128xf32, #tpu.memory_space<vmem>>, vector<1x16x16x4xf32>,
    %c0_65 = arith.constant 0 : index
    %c0_66 = arith.constant 0 : index
    %c0_67 = arith.constant 0 : index
    %c0_68 = arith.constant 0 : index
    %25 = vector.load %arg4[%c0_65, %c0_66, %c0_67, %c0_68] : memref<1x16x16x128xf32, #tpu.memory_space<vmem>>, vector<1x16x16x128xf32>
    %26 = vector.shape_cast %25 : vector<1x16x16x128xf32> to vector<256x128xf32>
    %c0_69 = arith.constant 0 : index
    %c0_70 = arith.constant 0 : index
    %27 = vector.load %arg2[%c0_69, %c0_70] : memref<128x128xf32, #tpu.memory_space<vmem>>, vector<128x128xf32>
    %cst_71 = arith.constant dense<0.000000e+00> : vector<256x128xf32>
    %28 = tpu.matmul %26, %27, %cst_71 {dimension_numbers = #tpu.dot_dimension_numbers<[1], [0], [0], [1], [0, 0, 1, 1], [], []>} : vector<256x128xf32>, vector<128x128xf32>, vector<256x128xf32> -> vector<256x128xf32>
    %29 = vector.shape_cast %28 : vector<256x128xf32> to vector<1x16x16x128xf32>
    %c0_72 = arith.constant 0 : index
    %c0_73 = arith.constant 0 : index
    %c0_74 = arith.constant 0 : index
    %c0_75 = arith.constant 0 : index
    %30 = vector.load %arg3[%c0_72, %c0_73, %c0_74, %c0_75] : memref<1x16x16x128xf32, #tpu.memory_space<vmem>>, vector<1x16x16x128xf32>
    tpu.vector_store %arg3[%c0_72, %c0_73, %c0_74, %c0_75], %29 {strides = array<i32>} : memref<1x16x16x128xf32, #tpu.memory_space<vmem>>, vector<1x16x16x128xf32>,
    return
  }
  func.func @transform_0(%arg0: i32) -> (i32, i32, i32, i32) {
    %c0_i32 = arith.constant 0 : i32
    %c0_i32_0 = arith.constant 0 : i32
    %c0_i32_1 = arith.constant 0 : i32
    %c0_i32_2 = arith.constant 0 : i32
    return %arg0, %c0_i32, %c0_i32_0, %c0_i32_1 : i32, i32, i32, i32
  }
  func.func @transform_1(%arg0: i32) -> (i32, i32) {
    %c0_i32 = arith.constant 0 : i32
    %c0_i32_0 = arith.constant 0 : i32
    %c0_i32_1 = arith.constant 0 : i32
    return %c0_i32, %c0_i32_0 : i32, i32
  }
  func.func @transform_2(%arg0: i32) -> (i32, i32, i32, i32) {
    %c0_i32 = arith.constant 0 : i32
    %c0_i32_0 = arith.constant 0 : i32
    %c0_i32_1 = arith.constant 0 : i32
    %c0_i32_2 = arith.constant 0 : i32
    return %arg0, %c0_i32, %c0_i32_0, %c0_i32_1 : i32, i32, i32, i32
  }
}

</mosaic_0001>

<bundles_post_ra>
// kernel: tpu_custom_call.1
= control target key start
LH: loop header
LB: loop body
LE: loop exit
PB: predicated region body
PF: predicated region fallthrough
CT: control target
= control target key end

     0   :  { %7 = vsyncpa [#allocation4], 0  ;;  %s3889_s0 = inlined_call_operand.vmem [shape: f32[2,18,18,4], index: 0, kind: input, shape index: {}]   ;;  %s3890_s1 = inlined_call_operand.vmem [shape: f32[128,128], index: 1, kind: input, shape index: {}]   ;;  %s3891_s2 = inlined_call_operand.hbm [shape: f32[2,16,16,128], index: 2, kind: output, shape index: {}]  }
   0x1   :  { %9 = vsyncpa [#allocation4 + $0x1], 0  ;;  %s2681_s9 = smov 0   ;;  %s2683_s10 = smov 0  }
   0x2   :  { %s2685_s11 = smov 0   ;;  %s2687_s12 = smov 0  }
   0x3 LB: > { %s2702_s13 = sadd.s32 4294967295, %s2652_s12   ;;  %s2175_s14 = sadd.s32 4294967294, %s2652_s12   ;;  %s2652_s12 = sphi %s2687_s12, %s3912_s12   ;;  %s2648_s11 = sphi %s2685_s11, %s3911_s11   ;;  %s2644_s10 = sphi %s2683_s10, %s3910_s10   ;;  %s2640_s9 = sphi %s2681_s9, %s3909_s9  }
   0x4   : > { %s2706_s15 = sadd.s32 1, %s2652_s12   ;;  %s69_s16 = sadd.s32 1, %s2648_s11 }
   0x5   : > { %s66_s17 = ssub.s32 %s2652_s12, %s2706_s15  ;;  %p79_p0 = scmp.ne.s32.totalorder %s2648_s11, %s2644_s10 }
   0x6   : > { %p67_p1 = scmp.eq.s32.totalorder %s66_s17, 0  ;;  %p80_p2 = scmp.eq.s32.totalorder %s2702_s13, 1 }
   0x7   : > { %p85_p3 = scmp.ne.s32.totalorder %s2644_s10, %s2640_s9  ;;  %p86_p4 = scmp.eq.s32.totalorder %s2175_s14, 1 }
   0x8   : > { %s2717_s18 = scalar_select %p67_p1, %s2648_s11, %s69_s16  }
   0x9   : > { %p2719_p5 = por %p80_p2, %p79_p0  ;;  %p2723_p6 = por %p86_p4, %p85_p3 }
   0xa   : > { %p2178_p7 = scmp.ge.s32.totalorder %s2652_s12, 1  ;;  %p115_p8 = scmp.lt.s32.totalorder %s2652_s12, 3 }
   0xc   : > { %p116_p9 = pnand %p2178_p7, %p115_p8 }
   0xe   : > { %119 = sbr.rel (%p116_p9) target bundleno = 890 (0x37a), region = 28 }
  0x13   : > { %v142_v0 = vlaneseq  ;;  %p137_p10 = scmp.lt.s32.totalorder %s2702_s13, 1  ;;  %v2654_v2 = vmov 0.0   ;;  %s2655_s23 = smov 36   ;;  %vm150_vm1 = vcmask 1047840   ;;  %vm215_vm2 = vcmask 31744  }
  0x14   : > { %s2656_s27 = smov 4   ;;  %s2657_s28 = smov 8   ;;  %vm408_vm3 = vcmask 64544   ;;  %vm601_vm4 = vcmask 97344   ;;  %vm795_vm5 = vcmask 130144   ;;  %vm988_vm6 = vcmask 162944  }
  0x15   : > { %v143_v1 = vand.u32 127, %v142_v0  ;;  %s138_s21 = scalar_select %p137_p10, %s2702_s13, 1  ;;  %vm1181_vm7 = vcmask 195744   ;;  %vm1375_vm8 = vcmask 228544   ;;  %vm1568_vm9 = vcmask 261344  }
  0x16   : > { %s2658_s29 = smov 12   ;;  %s2659_s30 = smov 16   ;;  %vm1761_vm10 = vcmask 294144  }
  0x17   : > { %vm144_vm0 = vcmp.eq.s32.totalorder %v143_v1, 0  ;;  %s2539_s22 = smul.u32 432, %s138_s21  ;;  %s2660_s5 = smov 20  }
  0x18   : > { %v145_v3 = vsel %vm144_vm0, 1.0, %v2654_v2  ;;  %s2662_s6 = smov 28   ;;  %s2663_s25 = smov 32  }
  0x19   : > { %147 = vrot.lane.b32.xlu0 %v145_v3, %s2655_s23  ;;  %s2734_s26 = scalar_lea.vmem %s3889_s0, %s2539_s22  ;;  %s2661_s23 = smov 24  }
  0x1a   : > { %v249_v4 = vld [vmem:[%s2734_s26 + $0x9] sm:$0xff]  ;;  %v248_v5 = vld [vmem:[%s2734_s26 + $0x1] sm:$0xff]  ;;  %v2740_v6 = vld [vmem:[%s2734_s26 + $0x19] sm:$0xff] }
  0x1b   : > { %314 = vrot.lane.b32.xlu1 %v249_v4, %s2656_s27  ;;  %v2744_v7 = vld [vmem:[%s2734_s26 + $0x21] sm:$0xff]  ;;  %v2749_v8 = vld [vmem:[%s2734_s26 + $0x31] sm:$0xff]  ;;  %v2754_v9 = vld [vmem:[%s2734_s26 + $0x39] sm:$0xff] }
  0x1c   : > { %v2759_v10 = vld [vmem:[%s2734_s26 + $0x49] sm:$0xff]  ;;  %v2764_v11 = vld [vmem:[%s2734_s26 + $0x51] sm:$0xff]  ;;  %v2769_v12 = vld [vmem:[%s2734_s26 + $0x61] sm:$0xff] }
  0x1d   : > { %312 = vrot.lane.b32.xlu0 %v248_v5, %s2656_s27  ;;  %v2774_v13 = vld [vmem:[%s2734_s26 + $0x69] sm:$0xff]  ;;  %v2779_v14 = vld [vmem:[%s2734_s26 + $0x79] sm:$0xff]  ;;  %v2784_v15 = vld [vmem:[%s2734_s26 + $0x81] sm:$0xff] }
  0x1e   : > { %v2789_v16 = vld [vmem:[%s2734_s26 + $0x91] sm:$0xff]  ;;  %v2794_v17 = vld [vmem:[%s2734_s26 + $0x99] sm:$0xff]  ;;  %v2799_v18 = vld [vmem:[%s2734_s26 + $0xa9] sm:$0xff] }
  0x1f   : > { %316 = vrot.lane.b32.xlu1 %v2740_v6, %s2656_s27  ;;  %v263_v19 = vld [vmem:[%s2734_s26 + $0xb1] sm:$0xff]  ;;  %v264_v20 = vld [vmem:[%s2734_s26 + $0xc1] sm:$0xff]  ;;  %v265_v21 = vld [vmem:[%s2734_s26 + $0xc9] sm:$0xff] }
  0x20   : > { %v2811_v22 = vld [vmem:[%s2734_s26 + $0xd9] sm:$0xff]  ;;  %v2815_v23 = vld [vmem:[%s2734_s26 + $0xe1] sm:$0xff]  ;;  %v2820_v24 = vld [vmem:[%s2734_s26 + $0xf1] sm:$0xff] }
  0x21   : > { %318 = vrot.lane.b32.xlu0 %v2744_v7, %s2656_s27  ;;  %v2825_v25 = vld [vmem:[%s2734_s26 + $0xf9] sm:$0xff]  ;;  %v270_v26 = vld [vmem:[%s2734_s26 + $0x109] sm:$0xff]  ;;  %v271_v27 = vld [vmem:[%s2734_s26 + $0x111] sm:$0xff] }
  0x22   : > { %v272_v28 = vld [vmem:[%s2734_s26 + $0x121] sm:$0xff]  ;;  %v273_v29 = vld [vmem:[%s2734_s26 + $0x129] sm:$0xff]  ;;  %v274_v30 = vld [vmem:[%s2734_s26 + $0x139] sm:$0xff] }
  0x23   : > { %320 = vrot.lane.b32.xlu1 %v2749_v8, %s2656_s27  ;;  %v275_v31 = vld [vmem:[%s2734_s26 + $0x141] sm:$0xff]  ;;  %v276_v32 = vld [vmem:[%s2734_s26 + $0x151] sm:$0xff]  ;;  %v277_v33 = vld [vmem:[%s2734_s26 + $0x159] sm:$0xff] }
  0x24   : > { %v278_v34 = vld [vmem:[%s2734_s26 + $0x169] sm:$0xff]  ;;  %v279_v35 = vld [vmem:[%s2734_s26 + $0x171] sm:$0xff]  ;;  %v2855_v38 = vld [vmem:[%s2734_s26 + $0x1a] sm:$0xff] }
  0x25   : > { %322 = vrot.lane.b32.xlu0 %v2754_v9, %s2656_s27  ;;  %v441_v36 = vld [vmem:[%s2734_s26 + $0x2] sm:$0xff]  ;;  %v442_v37 = vld [vmem:[%s2734_s26 + $0xa] sm:$0xff]  ;;  %v2864_v40 = vld [vmem:[%s2734_s26 + $0x32] sm:$0xff] }
  0x26   : > { %v2859_v39 = vld [vmem:[%s2734_s26 + $0x22] sm:$0xff]  ;;  %v2869_v41 = vld [vmem:[%s2734_s26 + $0x3a] sm:$0xff]  ;;  %v2874_v42 = vld [vmem:[%s2734_s26 + $0x4a] sm:$0xff] }
  0x27   : > { %324 = vrot.lane.b32.xlu1 %v2759_v10, %s2656_s27  ;;  %3901 = vst [vmem:[#allocation6_spill] sm:$0xff] %v2874_v42  ;;  %v2879_v43 = vld [vmem:[%s2734_s26 + $0x52] sm:$0xff]  ;;  %v449_v44 = vld [vmem:[%s2734_s26 + $0x62] sm:$0xff]  ;;  %v450_v45 = vld [vmem:[%s2734_s26 + $0x6a] sm:$0xff] }
  0x28   : > { %3902 = vst [vmem:[#allocation7_spill] sm:$0xff] %v2879_v43  ;;  %v451_v46 = vld [vmem:[%s2734_s26 + $0x7a] sm:$0xff]  ;;  %v452_v47 = vld [vmem:[%s2734_s26 + $0x82] sm:$0xff]  ;;  %v453_v48 = vld [vmem:[%s2734_s26 + $0x92] sm:$0xff] }
  0x29   : > { %326 = vrot.lane.b32.xlu0 %v2764_v11, %s2656_s27  ;;  %v454_v49 = vld [vmem:[%s2734_s26 + $0x9a] sm:$0xff]  ;;  %v455_v50 = vld [vmem:[%s2734_s26 + $0xaa] sm:$0xff]  ;;  %v456_v51 = vld [vmem:[%s2734_s26 + $0xb2] sm:$0xff] }
  0x2a   : > { %v457_v52 = vld [vmem:[%s2734_s26 + $0xc2] sm:$0xff]  ;;  %v458_v53 = vld [vmem:[%s2734_s26 + $0xca] sm:$0xff]  ;;  %v2905_v54 = vld [vmem:[%s2734_s26 + $0xda] sm:$0xff] }
  0x2b   : > { %328 = vrot.lane.b32.xlu1 %v2769_v12, %s2656_s27  ;;  %v2909_v55 = vld [vmem:[%s2734_s26 + $0xe2] sm:$0xff]  ;;  %v2914_v56 = vld [vmem:[%s2734_s26 + $0xf2] sm:$0xff]  ;;  %v2919_v57 = vld [vmem:[%s2734_s26 + $0xfa] sm:$0xff] }
  0x2c   : > { %v2924_v58 = vld [vmem:[%s2734_s26 + $0x10a] sm:$0xff]  ;;  %v2929_v59 = vld [vmem:[%s2734_s26 + $0x112] sm:$0xff]  ;;  %v465_v60 = vld [vmem:[%s2734_s26 + $0x122] sm:$0xff] }
  0x2d   : > { %330 = vrot.lane.b32.xlu0 %v2774_v13, %s2656_s27  ;;  %3903 = vst [vmem:[#allocation8_spill] sm:$0xff] %v2924_v58  ;;  %3904 = vst [vmem:[#allocation9_spill] sm:$0xff] %v2929_v59  ;;  %v2935_v61 = vld [vmem:[%s2734_s26 + $0x8] sm:$0xff]  ;;  %v2941_v63 = vld [vmem:[%s2734_s26] sm:$0xff] }
  0x2e   : > { %v2938_v62 = vld [vmem:[%s2734_s26 + $0x12a] sm:$0xff]  ;;  %v2944_v0 = vld [vmem:[%s2734_s26 + $0x18] sm:$0xff]  ;;  %v2947_v1 = vld [vmem:[%s2734_s26 + $0x20] sm:$0xff] }
  0x2f   : > { %332 = vrot.lane.b32.xlu1 %v2779_v14, %s2656_s27  ;;  %v2950_v2 = vld [vmem:[%s2734_s26 + $0x30] sm:$0xff]  ;;  %v2953_v3 = vld [vmem:[%s2734_s26 + $0x38] sm:$0xff]  ;;  %v2956_v4 = vld [vmem:[%s2734_s26 + $0x48] sm:$0xff] }
  0x30   : > { %v2959_v5 = vld [vmem:[%s2734_s26 + $0x50] sm:$0xff] }
  0x31   : > { %334 = vrot.lane.b32.xlu0 %v2784_v15, %s2656_s27 }
  0x33   : > { %336 = vrot.lane.b32.xlu1 %v2789_v16, %s2656_s27 }
  0x35   : > { %338 = vrot.lane.b32.xlu0 %v2794_v17, %s2656_s27 }
  0x37   : > { %340 = vrot.lane.b32.xlu1 %v2799_v18, %s2656_s27 }
  0x39   : > { %342 = vrot.lane.b32.xlu0 %v263_v19, %s2656_s27  ;;  %v2962_v19 = vld [vmem:[%s2734_s26 + $0x60] sm:$0xff] }
  0x3b   : > { %344 = vrot.lane.b32.xlu1 %v264_v20, %s2656_s27  ;;  %v2965_v20 = vld [vmem:[%s2734_s26 + $0x68] sm:$0xff] }
  0x3d   : > { %346 = vrot.lane.b32.xlu0 %v265_v21, %s2656_s27  ;;  %v2968_v21 = vld [vmem:[%s2734_s26 + $0x78] sm:$0xff] }
  0x3f   : > { %348 = vrot.lane.b32.xlu1 %v2811_v22, %s2656_s27 }
  0x41   : > { %350 = vrot.lane.b32.xlu0 %v2815_v23, %s2656_s27 }
  0x43   : > { %352 = vrot.lane.b32.xlu1 %v2820_v24, %s2656_s27 }
  0x45   : > { %354 = vrot.lane.b32.xlu0 %v2825_v25, %s2656_s27 }
  0x47   : > { %356 = vrot.lane.b32.xlu1 %v270_v26, %s2656_s27  ;;  %v2971_v26 = vld [vmem:[%s2734_s26 + $0x80] sm:$0xff] }
  0x49   : > { %358 = vrot.lane.b32.xlu0 %v271_v27, %s2656_s27  ;;  %v2974_v27 = vld [vmem:[%s2734_s26 + $0x90] sm:$0xff] }
  0x4b   : > { %360 = vrot.lane.b32.xlu1 %v272_v28, %s2656_s27  ;;  %v2977_v28 = vld [vmem:[%s2734_s26 + $0x98] sm:$0xff] }
  0x4d   : > { %362 = vrot.lane.b32.xlu0 %v273_v29, %s2656_s27  ;;  %v2980_v29 = vld [vmem:[%s2734_s26 + $0xa8] sm:$0xff] }
  0x4f   : > { %364 = vrot.lane.b32.xlu1 %v274_v30, %s2656_s27  ;;  %v2983_v30 = vld [vmem:[%s2734_s26 + $0xb0] sm:$0xff] }
  0x51   : > { %366 = vrot.lane.b32.xlu0 %v275_v31, %s2656_s27  ;;  %v2986_v31 = vld [vmem:[%s2734_s26 + $0xc0] sm:$0xff] }
  0x53   : > { %368 = vrot.lane.b32.xlu1 %v276_v32, %s2656_s27  ;;  %v2989_v32 = vld [vmem:[%s2734_s26 + $0xc8] sm:$0xff] }
  0x55   : > { %370 = vrot.lane.b32.xlu0 %v277_v33, %s2656_s27  ;;  %v2992_v33 = vld [vmem:[%s2734_s26 + $0xd8] sm:$0xff] }
  0x57   : > { %372 = vrot.lane.b32.xlu1 %v278_v34, %s2656_s27  ;;  %v2995_v34 = vld [vmem:[%s2734_s26 + $0xe0] sm:$0xff] }
  0x59   : > { %374 = vrot.lane.b32.xlu0 %v279_v35, %s2656_s27  ;;  %v2998_v35 = vld [vmem:[%s2734_s26 + $0xf0] sm:$0xff] }
  0x5b   : > { %505 = vrot.lane.b32.xlu1 %v441_v36, %s2657_s28  ;;  %v3001_v36 = vld [vmem:[%s2734_s26 + $0xf8] sm:$0xff] }
  0x5d   : > { %507 = vrot.lane.b32.xlu0 %v442_v37, %s2657_s28  ;;  %v3004_v37 = vld [vmem:[%s2734_s26 + $0x108] sm:$0xff] }
  0x5f   : > { %509 = vrot.lane.b32.xlu1 %v2855_v38, %s2657_s28 }
  0x61   : > { %511 = vrot.lane.b32.xlu0 %v2859_v39, %s2657_s28 }
  0x63   : > { %513 = vrot.lane.b32.xlu1 %v2864_v40, %s2657_s28 }
  0x65   : > { %515 = vrot.lane.b32.xlu0 %v2869_v41, %s2657_s28 }
  0x67   : > { %517 = vrot.lane.b32.xlu1 %v2874_v42, %s2657_s28 }
  0x69   : > { %519 = vrot.lane.b32.xlu0 %v2879_v43, %s2657_s28  ;;  %v470_v43 = vld [vmem:[%s2734_s26 + $0x15a] sm:$0xff] }
  0x6b   : > { %521 = vrot.lane.b32.xlu1 %v449_v44, %s2657_s28  ;;  %v3007_v44 = vld [vmem:[%s2734_s26 + $0x110] sm:$0xff] }
  0x6d   : > { %523 = vrot.lane.b32.xlu0 %v450_v45, %s2657_s28  ;;  %v3010_v45 = vld [vmem:[%s2734_s26 + $0x120] sm:$0xff] }
  0x6f   : > { %525 = vrot.lane.b32.xlu1 %v451_v46, %s2657_s28  ;;  %v3013_v46 = vld [vmem:[%s2734_s26 + $0x128] sm:$0xff] }
  0x71   : > { %527 = vrot.lane.b32.xlu0 %v452_v47, %s2657_s28  ;;  %v3018_v47 = vld [vmem:[%s2734_s26 + $0x138] sm:$0xff] }
  0x73   : > { %529 = vrot.lane.b32.xlu1 %v453_v48, %s2657_s28  ;;  %v3021_v48 = vld [vmem:[%s2734_s26 + $0x140] sm:$0xff] }
  0x75   : > { %531 = vrot.lane.b32.xlu0 %v454_v49, %s2657_s28  ;;  %v3024_v49 = vld [vmem:[%s2734_s26 + $0x150] sm:$0xff] }
  0x77   : > { %533 = vrot.lane.b32.xlu1 %v455_v50, %s2657_s28  ;;  %v3027_v50 = vld [vmem:[%s2734_s26 + $0x158] sm:$0xff] }
  0x79   : > { %535 = vrot.lane.b32.xlu0 %v456_v51, %s2657_s28  ;;  %v3030_v51 = vld [vmem:[%s2734_s26 + $0x168] sm:$0xff] }
  0x7b   : > { %537 = vrot.lane.b32.xlu1 %v457_v52, %s2657_s28  ;;  %v3033_v52 = vld [vmem:[%s2734_s26 + $0x170] sm:$0xff] }
  0x7d   : > { %539 = vrot.lane.b32.xlu0 %v458_v53, %s2657_s28 }
  0x7f   : > { %541 = vrot.lane.b32.xlu1 %v2905_v54, %s2657_s28 }
  0x81   : > { %543 = vrot.lane.b32.xlu0 %v2909_v55, %s2657_s28 }
  0x83   : > { %545 = vrot.lane.b32.xlu1 %v2914_v56, %s2657_s28 }
  0x85   : > { %547 = vrot.lane.b32.xlu0 %v2919_v57, %s2657_s28 }
  0x87   : > { %549 = vrot.lane.b32.xlu1 %v2924_v58, %s2657_s28 }
  0x89   : > { %551 = vrot.lane.b32.xlu0 %v2929_v59, %s2657_s28 }
  0x8b   : > { %v148_v53 = vpop.permute.xlu0 %147  ;;  %553 = vrot.lane.b32.xlu1 %v465_v60, %s2657_s28  ;;  %v467_v60 = vld [vmem:[%s2734_s26 + $0x13a] sm:$0xff] }
  0x8c   : > { %152 = vst.msk [vmem:[#allocation2 + $0x8] sm:$0xff] %vm150_vm1, %v148_v53  ;;  %151 = vst.msk [vmem:[#allocation2] sm:$0xff] %vm150_vm1, %v148_v53 }
  0x8d   : > { %153 = vst.msk [vmem:[#allocation2 + $0x10] sm:$0xff] %vm150_vm1, %v148_v53  ;;  %154 = vst.msk [vmem:[#allocation2 + $0x18] sm:$0xff] %vm150_vm1, %v148_v53  ;;  %v315_v59 = vpop.permute.xlu1 %314  ;;  %555 = vrot.lane.b32.xlu0 %v2938_v62, %s2657_s28 }
  0x8e   : > { %155 = vst.msk [vmem:[#allocation2 + $0x20] sm:$0xff] %vm150_vm1, %v148_v53  ;;  %156 = vst.msk [vmem:[#allocation2 + $0x28] sm:$0xff] %vm150_vm1, %v148_v53 }
  0x8f   : > { %157 = vst.msk [vmem:[#allocation2 + $0x30] sm:$0xff] %vm150_vm1, %v148_v53  ;;  %158 = vst.msk [vmem:[#allocation2 + $0x38] sm:$0xff] %vm150_vm1, %v148_v53  ;;  %557 = vrot.lane.b32.xlu1 %v467_v60, %s2657_s28  ;;  %v313_v62 = vpop.permute.xlu0 %312  ;;  %v472_v60 = vld [vmem:[%s2734_s26 + $0x172] sm:$0xff] }
  0x90   : > { %159 = vst.msk [vmem:[#allocation2 + $0x40] sm:$0xff] %vm150_vm1, %v148_v53  ;;  %160 = vst.msk [vmem:[#allocation2 + $0x48] sm:$0xff] %vm150_vm1, %v148_v53 }
  0x91   : > { %161 = vst.msk [vmem:[#allocation2 + $0x50] sm:$0xff] %vm150_vm1, %v148_v53  ;;  %162 = vst.msk [vmem:[#allocation2 + $0x58] sm:$0xff] %vm150_vm1, %v148_v53 }
  0x92   : > { %163 = vst.msk [vmem:[#allocation2 + $0x60] sm:$0xff] %vm150_vm1, %v148_v53  ;;  %164 = vst.msk [vmem:[#allocation2 + $0x68] sm:$0xff] %vm150_vm1, %v148_v53 }
  0x93   : > { %165 = vst.msk [vmem:[#allocation2 + $0x70] sm:$0xff] %vm150_vm1, %v148_v53  ;;  %166 = vst.msk [vmem:[#allocation2 + $0x78] sm:$0xff] %vm150_vm1, %v148_v53  ;;  %v319_v58 = vpop.permute.xlu0 %318 }
  0x94   : > { %167 = vst.msk [vmem:[#allocation2 + $0x80] sm:$0xff] %vm150_vm1, %v148_v53  ;;  %168 = vst.msk [vmem:[#allocation2 + $0x88] sm:$0xff] %vm150_vm1, %v148_v53 }
  0x95   : > { %169 = vst.msk [vmem:[#allocation2 + $0x90] sm:$0xff] %vm150_vm1, %v148_v53  ;;  %170 = vst.msk [vmem:[#allocation2 + $0x98] sm:$0xff] %vm150_vm1, %v148_v53 }
  0x96   : > { %171 = vst.msk [vmem:[#allocation2 + $0xa0] sm:$0xff] %vm150_vm1, %v148_v53  ;;  %172 = vst.msk [vmem:[#allocation2 + $0xa8] sm:$0xff] %vm150_vm1, %v148_v53 }
  0x97   : > { %173 = vst.msk [vmem:[#allocation2 + $0xb0] sm:$0xff] %vm150_vm1, %v148_v53  ;;  %174 = vst.msk [vmem:[#allocation2 + $0xb8] sm:$0xff] %vm150_vm1, %v148_v53 }
  0x98   : > { %175 = vst.msk [vmem:[#allocation2 + $0xc0] sm:$0xff] %vm150_vm1, %v148_v53  ;;  %176 = vst.msk [vmem:[#allocation2 + $0xc8] sm:$0xff] %vm150_vm1, %v148_v53 }
  0x99   : > { %177 = vst.msk [vmem:[#allocation2 + $0xd0] sm:$0xff] %vm150_vm1, %v148_v53  ;;  %178 = vst.msk [vmem:[#allocation2 + $0xd8] sm:$0xff] %vm150_vm1, %v148_v53 }
  0x9a   : > { %179 = vst.msk [vmem:[#allocation2 + $0xe0] sm:$0xff] %vm150_vm1, %v148_v53  ;;  %180 = vst.msk [vmem:[#allocation2 + $0xe8] sm:$0xff] %vm150_vm1, %v148_v53 }
  0x9b   : > { %181 = vst.msk [vmem:[#allocation2 + $0xf0] sm:$0xff] %vm150_vm1, %v148_v53  ;;  %182 = vst.msk [vmem:[#allocation2 + $0xf8] sm:$0xff] %vm150_vm1, %v148_v53  ;;  %v317_v53 = vpop.permute.xlu1 %316 }
  0x9c   : > { %217 = vst.msk [vmem:[#allocation2 + $0x8] sm:$0xff] %vm215_vm2, %v2935_v61  ;;  %216 = vst.msk [vmem:[#allocation2] sm:$0xff] %vm215_vm2, %v2941_v63  ;;  %v468_v61 = vld [vmem:[%s2734_s26 + $0x142] sm:$0xff]  ;;  %v469_v63 = vld [vmem:[%s2734_s26 + $0x152] sm:$0xff] }
  0x9d   : > { %218 = vst.msk [vmem:[#allocation2 + $0x10] sm:$0xff] %vm215_vm2, %v2944_v0  ;;  %219 = vst.msk [vmem:[#allocation2 + $0x18] sm:$0xff] %vm215_vm2, %v2947_v1  ;;  %559 = vrot.lane.b32.xlu0 %v468_v61, %s2657_s28  ;;  %561 = vrot.lane.b32.xlu1 %v469_v63, %s2657_s28 }
  0x9e   : > { %220 = vst.msk [vmem:[#allocation2 + $0x20] sm:$0xff] %vm215_vm2, %v2950_v2  ;;  %221 = vst.msk [vmem:[#allocation2 + $0x28] sm:$0xff] %vm215_vm2, %v2953_v3 }
  0x9f   : > { %222 = vst.msk [vmem:[#allocation2 + $0x30] sm:$0xff] %vm215_vm2, %v2956_v4  ;;  %223 = vst.msk [vmem:[#allocation2 + $0x38] sm:$0xff] %vm215_vm2, %v2959_v5  ;;  %v321_v42 = vpop.permute.xlu1 %320 }
  0xa0   : > { %224 = vst.msk [vmem:[#allocation2 + $0x40] sm:$0xff] %vm215_vm2, %v2962_v19  ;;  %225 = vst.msk [vmem:[#allocation2 + $0x48] sm:$0xff] %vm215_vm2, %v2965_v20 }
  0xa1   : > { %226 = vst.msk [vmem:[#allocation2 + $0x50] sm:$0xff] %vm215_vm2, %v2968_v21  ;;  %227 = vst.msk [vmem:[#allocation2 + $0x58] sm:$0xff] %vm215_vm2, %v2971_v26  ;;  %563 = vrot.lane.b32.xlu0 %v470_v43, %s2657_s28 }
  0xa2   : > { %228 = vst.msk [vmem:[#allocation2 + $0x60] sm:$0xff] %vm215_vm2, %v2974_v27  ;;  %229 = vst.msk [vmem:[#allocation2 + $0x68] sm:$0xff] %vm215_vm2, %v2977_v28 }
  0xa3   : > { %230 = vst.msk [vmem:[#allocation2 + $0x70] sm:$0xff] %vm215_vm2, %v2980_v29  ;;  %231 = vst.msk [vmem:[#allocation2 + $0x78] sm:$0xff] %vm215_vm2, %v2983_v30  ;;  %v325_v61 = vpop.permute.xlu1 %324 }
  0xa4   : > { %232 = vst.msk [vmem:[#allocation2 + $0x80] sm:$0xff] %vm215_vm2, %v2986_v31  ;;  %233 = vst.msk [vmem:[#allocation2 + $0x88] sm:$0xff] %vm215_vm2, %v2989_v32 }
  0xa5   : > { %234 = vst.msk [vmem:[#allocation2 + $0x90] sm:$0xff] %vm215_vm2, %v2992_v33  ;;  %235 = vst.msk [vmem:[#allocation2 + $0x98] sm:$0xff] %vm215_vm2, %v2995_v34  ;;  %567 = vrot.lane.b32.xlu0 %v472_v60, %s2657_s28 }
  0xa6   : > { %236 = vst.msk [vmem:[#allocation2 + $0xa0] sm:$0xff] %vm215_vm2, %v2998_v35  ;;  %237 = vst.msk [vmem:[#allocation2 + $0xa8] sm:$0xff] %vm215_vm2, %v3001_v36 }
  0xa7   : > { %238 = vst.msk [vmem:[#allocation2 + $0xb0] sm:$0xff] %vm215_vm2, %v3004_v37  ;;  %239 = vst.msk [vmem:[#allocation2 + $0xb8] sm:$0xff] %vm215_vm2, %v3007_v44  ;;  %v329_v43 = vpop.permute.xlu1 %328 }
  0xa8   : > { %240 = vst.msk [vmem:[#allocation2 + $0xc0] sm:$0xff] %vm215_vm2, %v3010_v45  ;;  %241 = vst.msk [vmem:[#allocation2 + $0xc8] sm:$0xff] %vm215_vm2, %v3013_v46 }
  0xa9   : > { %242 = vst.msk [vmem:[#allocation2 + $0xd0] sm:$0xff] %vm215_vm2, %v3018_v47  ;;  %243 = vst.msk [vmem:[#allocation2 + $0xd8] sm:$0xff] %vm215_vm2, %v3021_v48  ;;  %701 = vrot.lane.b32.xlu0 %v2947_v1, %s2658_s29 }
  0xaa   : > { %244 = vst.msk [vmem:[#allocation2 + $0xe0] sm:$0xff] %vm215_vm2, %v3024_v49  ;;  %245 = vst.msk [vmem:[#allocation2 + $0xe8] sm:$0xff] %vm215_vm2, %v3027_v50 }
  0xab   : > { %246 = vst.msk [vmem:[#allocation2 + $0xf0] sm:$0xff] %vm215_vm2, %v3030_v51  ;;  %247 = vst.msk [vmem:[#allocation2 + $0xf8] sm:$0xff] %vm215_vm2, %v3033_v52  ;;  %v333_v63 = vpop.permute.xlu1 %332 }
  0xac   : > { %410 = vst.msk [vmem:[#allocation2 + $0x8] sm:$0xff] %vm408_vm3, %v315_v59  ;;  %409 = vst.msk [vmem:[#allocation2] sm:$0xff] %vm408_vm3, %v313_v62  ;;  %v471_v59 = vld [vmem:[%s2734_s26 + $0x16a] sm:$0xff]  ;;  %v323_v62 = vpop.permute.xlu0 %322 }
  0xad   : > { %411 = vst.msk [vmem:[#allocation2 + $0x10] sm:$0xff] %vm408_vm3, %v317_v53  ;;  %412 = vst.msk [vmem:[#allocation2 + $0x18] sm:$0xff] %vm408_vm3, %v319_v58  ;;  %565 = vrot.lane.b32.xlu1 %v471_v59, %s2657_s28  ;;  %705 = vrot.lane.b32.xlu0 %v2953_v3, %s2658_s29 }
  0xae   : > { %413 = vst.msk [vmem:[#allocation2 + $0x20] sm:$0xff] %vm408_vm3, %v321_v42  ;;  %414 = vst.msk [vmem:[#allocation2 + $0x28] sm:$0xff] %vm408_vm3, %v323_v62 }
  0xaf   : > { %415 = vst.msk [vmem:[#allocation2 + $0x30] sm:$0xff] %vm408_vm3, %v325_v61  ;;  %417 = vst.msk [vmem:[#allocation2 + $0x40] sm:$0xff] %vm408_vm3, %v329_v43  ;;  %v337_v1 = vpop.permute.xlu1 %336 }
  0xb0   : > { %v327_v58 = vpop.permute.xlu0 %326  ;;  %419 = vst.msk [vmem:[#allocation2 + $0x50] sm:$0xff] %vm408_vm3, %v333_v63  ;;  %421 = vst.msk [vmem:[#allocation2 + $0x60] sm:$0xff] %vm408_vm3, %v337_v1 }
  0xb1   : > { %699 = vrot.lane.b32.xlu1 %v2944_v0, %s2658_s29  ;;  %416 = vst.msk [vmem:[#allocation2 + $0x38] sm:$0xff] %vm408_vm3, %v327_v58  ;;  %709 = vrot.lane.b32.xlu0 %v2959_v5, %s2658_s29 }
  0xb3   : > { %v341_v59 = vpop.permute.xlu1 %340 }
  0xb4   : > { %v331_v42 = vpop.permute.xlu0 %330  ;;  %423 = vst.msk [vmem:[#allocation2 + $0x70] sm:$0xff] %vm408_vm3, %v341_v59 }
  0xb5   : > { %703 = vrot.lane.b32.xlu1 %v2950_v2, %s2658_s29  ;;  %418 = vst.msk [vmem:[#allocation2 + $0x48] sm:$0xff] %vm408_vm3, %v331_v42  ;;  %713 = vrot.lane.b32.xlu0 %v2965_v20, %s2658_s29 }
  0xb7   : > { %v345_v62 = vpop.permute.xlu1 %344 }
  0xb8   : > { %v335_v0 = vpop.permute.xlu0 %334  ;;  %425 = vst.msk [vmem:[#allocation2 + $0x80] sm:$0xff] %vm408_vm3, %v345_v62 }
  0xb9   : > { %707 = vrot.lane.b32.xlu1 %v2956_v4, %s2658_s29  ;;  %420 = vst.msk [vmem:[#allocation2 + $0x58] sm:$0xff] %vm408_vm3, %v335_v0  ;;  %717 = vrot.lane.b32.xlu0 %v2971_v26, %s2658_s29 }
  0xbb   : > { %v349_v58 = vpop.permute.xlu1 %348 }
  0xbc   : > { %v339_v53 = vpop.permute.xlu0 %338  ;;  %427 = vst.msk [vmem:[#allocation2 + $0x90] sm:$0xff] %vm408_vm3, %v349_v58 }
  0xbd   : > { %711 = vrot.lane.b32.xlu1 %v2962_v19, %s2658_s29  ;;  %422 = vst.msk [vmem:[#allocation2 + $0x68] sm:$0xff] %vm408_vm3, %v339_v53  ;;  %721 = vrot.lane.b32.xlu0 %v2977_v28, %s2658_s29 }
  0xbf   : > { %v353_v42 = vpop.permute.xlu1 %352 }
  0xc0   : > { %v343_v60 = vpop.permute.xlu0 %342  ;;  %429 = vst.msk [vmem:[#allocation2 + $0xa0] sm:$0xff] %vm408_vm3, %v353_v42 }
  0xc1   : > { %715 = vrot.lane.b32.xlu1 %v2968_v21, %s2658_s29  ;;  %424 = vst.msk [vmem:[#allocation2 + $0x78] sm:$0xff] %vm408_vm3, %v343_v60  ;;  %725 = vrot.lane.b32.xlu0 %v2983_v30, %s2658_s29 }
  0xc3   : > { %v357_v28 = vpop.permute.xlu1 %356 }
  0xc4   : > { %v347_v61 = vpop.permute.xlu0 %346  ;;  %431 = vst.msk [vmem:[#allocation2 + $0xb0] sm:$0xff] %vm408_vm3, %v357_v28 }
  0xc5   : > { %719 = vrot.lane.b32.xlu1 %v2974_v27, %s2658_s29  ;;  %426 = vst.msk [vmem:[#allocation2 + $0x88] sm:$0xff] %vm408_vm3, %v347_v61  ;;  %729 = vrot.lane.b32.xlu0 %v2989_v32, %s2658_s29  ;;  %v2211_v61 = vld [vmem:[%s2734_s26 + $0x180] sm:$0xff] }
  0xc7   : > { %v361_v30 = vpop.permute.xlu1 %360 }
  0xc8   : > { %v351_v43 = vpop.permute.xlu0 %350  ;;  %433 = vst.msk [vmem:[#allocation2 + $0xc0] sm:$0xff] %vm408_vm3, %v361_v30 }
  0xc9   : > { %723 = vrot.lane.b32.xlu1 %v2980_v29, %s2658_s29  ;;  %428 = vst.msk [vmem:[#allocation2 + $0x98] sm:$0xff] %vm408_vm3, %v351_v43  ;;  %733 = vrot.lane.b32.xlu0 %v2995_v34, %s2658_s29  ;;  %v2212_v43 = vld [vmem:[%s2734_s26 + $0x188] sm:$0xff] }
  0xcb   : > { %v365_v32 = vpop.permute.xlu1 %364 }
  0xcc   : > { %v355_v27 = vpop.permute.xlu0 %354  ;;  %435 = vst.msk [vmem:[#allocation2 + $0xd0] sm:$0xff] %vm408_vm3, %v365_v32  ;;  %v1838_v32 = vld [vmem:[%s3890_s1 + $0x60] sm:$0xff] }
  0xcd   : > { %727 = vrot.lane.b32.xlu1 %v2986_v31, %s2658_s29  ;;  %430 = vst.msk [vmem:[#allocation2 + $0xa8] sm:$0xff] %vm408_vm3, %v355_v27  ;;  %737 = vrot.lane.b32.xlu0 %v3001_v36, %s2658_s29 }
  0xcf   : > { %v369_v34 = vpop.permute.xlu1 %368 }
  0xd0   : > { %v359_v29 = vpop.permute.xlu0 %358  ;;  %437 = vst.msk [vmem:[#allocation2 + $0xe0] sm:$0xff] %vm408_vm3, %v369_v34 }
  0xd1   : > { %731 = vrot.lane.b32.xlu1 %v2992_v33, %s2658_s29  ;;  %432 = vst.msk [vmem:[#allocation2 + $0xb8] sm:$0xff] %vm408_vm3, %v359_v29  ;;  %741 = vrot.lane.b32.xlu0 %v3007_v44, %s2658_s29 }
  0xd3   : > { %v373_v0 = vpop.permute.xlu1 %372 }
  0xd4   : > { %v363_v31 = vpop.permute.xlu0 %362  ;;  %439 = vst.msk [vmem:[#allocation2 + $0xf0] sm:$0xff] %vm408_vm3, %v373_v0  ;;  %v1834_v0 = vld [vmem:[%s3890_s1 + $0x40] sm:$0xff] }
  0xd5   : > { %735 = vrot.lane.b32.xlu1 %v2998_v35, %s2658_s29  ;;  %434 = vst.msk [vmem:[#allocation2 + $0xc8] sm:$0xff] %vm408_vm3, %v363_v31  ;;  %745 = vrot.lane.b32.xlu0 %v3013_v46, %s2658_s29  ;;  %v1839_v31 = vld [vmem:[%s3890_s1 + $0x68] sm:$0xff] }
  0xd7   : > { %v506_v53 = vpop.permute.xlu1 %505 }
  0xd8   : > { %v367_v33 = vpop.permute.xlu0 %366  ;;  %602 = vst.msk [vmem:[#allocation2] sm:$0xff] %vm601_vm4, %v506_v53 }
  0xd9   : > { %739 = vrot.lane.b32.xlu1 %v3004_v37, %s2658_s29  ;;  %436 = vst.msk [vmem:[#allocation2 + $0xd8] sm:$0xff] %vm408_vm3, %v367_v33  ;;  %749 = vrot.lane.b32.xlu0 %v3021_v48, %s2658_s29  ;;  %v1837_v33 = vld [vmem:[%s3890_s1 + $0x58] sm:$0xff] }
  0xdb   : > { %v510_v60 = vpop.permute.xlu1 %509 }
  0xdc   : > { %v371_v63 = vpop.permute.xlu0 %370  ;;  %604 = vst.msk [vmem:[#allocation2 + $0x10] sm:$0xff] %vm601_vm4, %v510_v60  ;;  %v1831_v60 = vld [vmem:[%s3890_s1 + $0x28] sm:$0xff] }
  0xdd   : > { %743 = vrot.lane.b32.xlu1 %v3010_v45, %s2658_s29  ;;  %438 = vst.msk [vmem:[#allocation2 + $0xe8] sm:$0xff] %vm408_vm3, %v371_v63  ;;  %753 = vrot.lane.b32.xlu0 %v3027_v50, %s2658_s29 }
  0xdf   : > { %v514_v58 = vpop.permute.xlu1 %513 }
  0xe0   : > { %v375_v1 = vpop.permute.xlu0 %374  ;;  %606 = vst.msk [vmem:[#allocation2 + $0x20] sm:$0xff] %vm601_vm4, %v514_v58 }
  0xe1   : > { %747 = vrot.lane.b32.xlu1 %v3018_v47, %s2658_s29  ;;  %440 = vst.msk [vmem:[#allocation2 + $0xf8] sm:$0xff] %vm408_vm3, %v375_v1  ;;  %757 = vrot.lane.b32.xlu0 %v3033_v52, %s2658_s29 }
  0xe3   : > { %v518_v50 = vpop.permute.xlu1 %517 }
  0xe4   : > { %v508_v59 = vpop.permute.xlu0 %507  ;;  %608 = vst.msk [vmem:[#allocation2 + $0x30] sm:$0xff] %vm601_vm4, %v518_v50 }
  0xe5   : > { %751 = vrot.lane.b32.xlu1 %v3024_v49, %s2658_s29  ;;  %603 = vst.msk [vmem:[#allocation2 + $0x8] sm:$0xff] %vm601_vm4, %v508_v59  ;;  %761 = vrot.lane.b32.xlu0 %v2212_v43, %s2658_s29 }
  0xe7   : > { %v522_v52 = vpop.permute.xlu1 %521 }
  0xe8   : > { %v512_v62 = vpop.permute.xlu0 %511  ;;  %610 = vst.msk [vmem:[#allocation2 + $0x40] sm:$0xff] %vm601_vm4, %v522_v52 }
  0xe9   : > { %755 = vrot.lane.b32.xlu1 %v3030_v51, %s2658_s29  ;;  %605 = vst.msk [vmem:[#allocation2 + $0x18] sm:$0xff] %vm601_vm4, %v512_v62  ;;  %894 = vrot.lane.b32.xlu0 %v2744_v7, %s2659_s30 }
  0xeb   : > { %v526_v28 = vpop.permute.xlu1 %525 }
  0xec   : > { %v516_v42 = vpop.permute.xlu0 %515  ;;  %612 = vst.msk [vmem:[#allocation2 + $0x50] sm:$0xff] %vm601_vm4, %v526_v28 }
  0xed   : > { %759 = vrot.lane.b32.xlu1 %v2211_v61, %s2658_s29  ;;  %607 = vst.msk [vmem:[#allocation2 + $0x28] sm:$0xff] %vm601_vm4, %v516_v42  ;;  %898 = vrot.lane.b32.xlu0 %v2754_v9, %s2659_s30  ;;  %v1829_v61 = vld [vmem:[%s3890_s1 + $0x18] sm:$0xff]  ;;  %v1828_v42 = vld [vmem:[%s3890_s1 + $0x10] sm:$0xff] }
  0xef   : > { %v530_v7 = vpop.permute.xlu1 %529 }
  0xf0   : > { %v520_v51 = vpop.permute.xlu0 %519  ;;  %614 = vst.msk [vmem:[#allocation2 + $0x60] sm:$0xff] %vm601_vm4, %v530_v7 }
  0xf1   : > { %892 = vrot.lane.b32.xlu1 %v2740_v6, %s2659_s30  ;;  %609 = vst.msk [vmem:[#allocation2 + $0x38] sm:$0xff] %vm601_vm4, %v520_v51  ;;  %902 = vrot.lane.b32.xlu0 %v2764_v11, %s2659_s30  ;;  %v1827_v51 = vld [vmem:[%s3890_s1 + $0x8] sm:$0xff] }
  0xf3   : > { %v534_v30 = vpop.permute.xlu1 %533 }
  0xf4   : > { %v524_v27 = vpop.permute.xlu0 %523  ;;  %616 = vst.msk [vmem:[#allocation2 + $0x70] sm:$0xff] %vm601_vm4, %v534_v30 }
  0xf5   : > { %896 = vrot.lane.b32.xlu1 %v2749_v8, %s2659_s30  ;;  %611 = vst.msk [vmem:[#allocation2 + $0x48] sm:$0xff] %vm601_vm4, %v524_v27  ;;  %906 = vrot.lane.b32.xlu0 %v2774_v13, %s2659_s30 }
  0xf7   : > { %v538_v11 = vpop.permute.xlu1 %537 }
  0xf8   : > { %v528_v6 = vpop.permute.xlu0 %527  ;;  %618 = vst.msk [vmem:[#allocation2 + $0x80] sm:$0xff] %vm601_vm4, %v538_v11 }
  0xf9   : > { %900 = vrot.lane.b32.xlu1 %v2759_v10, %s2659_s30  ;;  %613 = vst.msk [vmem:[#allocation2 + $0x58] sm:$0xff] %vm601_vm4, %v528_v6  ;;  %910 = vrot.lane.b32.xlu0 %v2784_v15, %s2659_s30 }
  0xfb   : > { %v542_v13 = vpop.permute.xlu1 %541 }
  0xfc   : > { %v532_v29 = vpop.permute.xlu0 %531  ;;  %620 = vst.msk [vmem:[#allocation2 + $0x90] sm:$0xff] %vm601_vm4, %v542_v13  ;;  %v3905_v13 = vld [vmem:[#allocation6_spill] sm:$0xff] }
  0xfd   : > { %904 = vrot.lane.b32.xlu1 %v2769_v12, %s2659_s30  ;;  %615 = vst.msk [vmem:[#allocation2 + $0x68] sm:$0xff] %vm601_vm4, %v532_v29  ;;  %914 = vrot.lane.b32.xlu0 %v2794_v17, %s2659_s30  ;;  %v1841_v17 = vld [vmem:[%s3890_s1 + $0x78] sm:$0xff] }
  0xfe   : > { %2427 = vmatprep.subr.mxu0 %v1841_v17  ;;  %2507 = vmatprep.subr.mxu1 %v1841_v17 }
  0xff   : > { %v546_v15 = vpop.permute.xlu1 %545  ;;  %2428 = vmatpush3.msra.mxu0 %v1841_v17  ;;  %2523 = vmatpush3.msra.mxu1 %v1841_v17 }
 0x100   : > { %v536_v10 = vpop.permute.xlu0 %535  ;;  %622 = vst.msk [vmem:[#allocation2 + $0xa0] sm:$0xff] %vm601_vm4, %v546_v15 }
 0x101   : > { %908 = vrot.lane.b32.xlu1 %v2779_v14, %s2659_s30  ;;  %617 = vst.msk [vmem:[#allocation2 + $0x78] sm:$0xff] %vm601_vm4, %v536_v10  ;;  %924 = vrot.lane.b32.xlu0 %v2811_v22, %s2659_s30  ;;  %v1840_v22 = vld [vmem:[%s3890_s1 + $0x70] sm:$0xff] }
 0x102   : > { %2429 = vmatprep.subr.mxu0 %v1840_v22  ;;  %2508 = vmatprep.subr.mxu1 %v1840_v22 }
 0x103   : > { %2430 = vmatpush3.msra.mxu0 %v1840_v22  ;;  %2524 = vmatpush3.msra.mxu1 %v1840_v22 }
 0x104   : > { %v540_v12 = vpop.permute.xlu0 %539  ;;  %2431 = vmatprep.subr.mxu0 %v1839_v31  ;;  %2509 = vmatprep.subr.mxu1 %v1839_v31 }
 0x105   : > { %912 = vrot.lane.b32.xlu1 %v2789_v16, %s2659_s30  ;;  %619 = vst.msk [vmem:[#allocation2 + $0x88] sm:$0xff] %vm601_vm4, %v540_v12  ;;  %1085 = vrot.lane.b32.xlu0 %v2855_v38, %s2660_s5 }
 0x106   : > { %2432 = vmatpush3.msra.mxu0 %v1839_v31  ;;  %2525 = vmatpush3.msra.mxu1 %v1839_v31  ;;  %v3907_v31 = vld [vmem:[#allocation7_spill] sm:$0xff] }
 0x107   : > { %2433 = vmatprep.subr.mxu0 %v1838_v32  ;;  %2510 = vmatprep.subr.mxu1 %v1838_v32 }
 0x108   : > { %v544_v14 = vpop.permute.xlu0 %543  ;;  %2434 = vmatpush3.msra.mxu0 %v1838_v32  ;;  %2526 = vmatpush3.msra.mxu1 %v1838_v32  ;;  %v3908_v32 = vld [vmem:[#allocation9_spill] sm:$0xff] }
 0x109   : > { %916 = vrot.lane.b32.xlu1 %v2799_v18, %s2659_s30  ;;  %621 = vst.msk [vmem:[#allocation2 + $0x98] sm:$0xff] %vm601_vm4, %v544_v14  ;;  %v550_v18 = vpop.permute.xlu1 %549  ;;  %1087 = vrot.lane.b32.xlu0 %v2859_v39, %s2660_s5 }
 0x10a   : > { %624 = vst.msk [vmem:[#allocation2 + $0xb0] sm:$0xff] %vm601_vm4, %v550_v18  ;;  %2435 = vmatprep.subr.mxu0 %v1837_v33  ;;  %2511 = vmatprep.subr.mxu1 %v1837_v33 }
 0x10b   : > { %2436 = vmatpush3.msra.mxu0 %v1837_v33  ;;  %2527 = vmatpush3.msra.mxu1 %v1837_v33 }
 0x10c   : > { %v548_v16 = vpop.permute.xlu0 %547 }
 0x10d   : > { %926 = vrot.lane.b32.xlu1 %v2815_v23, %s2659_s30  ;;  %623 = vst.msk [vmem:[#allocation2 + $0xa8] sm:$0xff] %vm601_vm4, %v548_v16  ;;  %v554_v38 = vpop.permute.xlu1 %553  ;;  %1279 = vrot.lane.b32.xlu0 %v2950_v2, %s2661_s23  ;;  %v1835_v2 = vld [vmem:[%s3890_s1 + $0x48] sm:$0xff]  ;;  %v3906_v16 = vld [vmem:[#allocation8_spill] sm:$0xff] }
 0x10e   : > { %626 = vst.msk [vmem:[#allocation2 + $0xc0] sm:$0xff] %vm601_vm4, %v554_v38  ;;  %v2250_v38 = vld [vmem:[%s2734_s26 + $0x52] sm:$0xff] }
 0x110   : > { %v552_v23 = vpop.permute.xlu0 %551 }
 0x111   : > { %1117 = vrot.lane.b32.xlu1 %v2905_v54, %s2660_s5  ;;  %625 = vst.msk [vmem:[#allocation2 + $0xb8] sm:$0xff] %vm601_vm4, %v552_v23  ;;  %v558_v39 = vpop.permute.xlu1 %557  ;;  %1281 = vrot.lane.b32.xlu0 %v2953_v3, %s2661_s23  ;;  %v1833_v3 = vld [vmem:[%s3890_s1 + $0x38] sm:$0xff] }
 0x112   : > { %628 = vst.msk [vmem:[#allocation2 + $0xd0] sm:$0xff] %vm601_vm4, %v558_v39 }
 0x114   : > { %v556_v54 = vpop.permute.xlu0 %555 }
 0x115   : > { %1119 = vrot.lane.b32.xlu1 %v2909_v55, %s2660_s5  ;;  %627 = vst.msk [vmem:[#allocation2 + $0xc8] sm:$0xff] %vm601_vm4, %v556_v54  ;;  %v1836_v55 = vld [vmem:[%s3890_s1 + $0x50] sm:$0xff]  ;;  %v562_v63 = vpop.permute.xlu1 %561  ;;  %1472 = vrot.lane.b32.xlu0 %v2749_v8, %s2662_s6 }
 0x116   : > { %2437 = vmatprep.subr.mxu0 %v1836_v55  ;;  %630 = vst.msk [vmem:[#allocation2 + $0xe0] sm:$0xff] %vm601_vm4, %v562_v63  ;;  %2512 = vmatprep.subr.mxu1 %v1836_v55  ;;  %v1832_v8 = vld [vmem:[%s3890_s1 + $0x30] sm:$0xff]  ;;  %v2313_v63 = vld [vmem:[%s2734_s26 + $0x61] sm:$0xff] }
 0x117   : > { %2438 = vmatpush3.msra.mxu0 %v1836_v55  ;;  %2528 = vmatpush3.msra.mxu1 %v1836_v55 }
 0x118   : > { %v560_v34 = vpop.permute.xlu0 %559  ;;  %2439 = vmatprep.subr.mxu0 %v1835_v2  ;;  %2513 = vmatprep.subr.mxu1 %v1835_v2 }
 0x119   : > { %1311 = vrot.lane.b32.xlu1 %v2998_v35, %s2661_s23  ;;  %629 = vst.msk [vmem:[#allocation2 + $0xd8] sm:$0xff] %vm601_vm4, %v560_v34  ;;  %2440 = vmatpush3.msra.mxu0 %v1835_v2 }
 0x11a   : > { %2441 = vmatprep.subr.mxu0 %v1834_v0  ;;  %2529 = vmatpush3.msra.mxu1 %v1835_v2 }
 0x11b   : > { %2442 = vmatpush3.msra.mxu0 %v1834_v0  ;;  %2514 = vmatprep.subr.mxu1 %v1834_v0 }
 0x11c   : > { %v564_v35 = vpop.permute.xlu0 %563  ;;  %2443 = vmatprep.subr.mxu0 %v1833_v3  ;;  %928 = vrot.lane.b32.xlu0 %v2820_v24, %s2659_s30 }
 0x11d   : > { %1313 = vrot.lane.b32.xlu1 %v3001_v36, %s2661_s23  ;;  %631 = vst.msk [vmem:[#allocation2 + $0xe8] sm:$0xff] %vm601_vm4, %v564_v35  ;;  %2530 = vmatpush3.msra.mxu1 %v1834_v0  ;;  %v2314_v0 = vld [vmem:[%s2734_s26 + $0x69] sm:$0xff] }
 0x11e   : > { %2444 = vmatpush3.msra.mxu0 %v1833_v3  ;;  %2515 = vmatprep.subr.mxu1 %v1833_v3 }
 0x11f   : > { %v566_v1 = vpop.permute.xlu1 %565  ;;  %2445 = vmatprep.subr.mxu0 %v1832_v8  ;;  %2531 = vmatpush3.msra.mxu1 %v1833_v3 }
 0x120   : > { %632 = vst.msk [vmem:[#allocation2 + $0xf0] sm:$0xff] %vm601_vm4, %v566_v1  ;;  %v568_v36 = vpop.permute.xlu0 %567  ;;  %2446 = vmatpush3.msra.mxu0 %v1832_v8  ;;  %1506 = vrot.lane.b32.xlu0 %v2825_v25, %s2662_s6 }
 0x121   : > { %1504 = vrot.lane.b32.xlu1 %v2820_v24, %s2662_s6  ;;  %633 = vst.msk [vmem:[#allocation2 + $0xf8] sm:$0xff] %vm601_vm4, %v568_v36  ;;  %2516 = vmatprep.subr.mxu1 %v1832_v8  ;;  %v1830_v24 = vld [vmem:[%s3890_s1 + $0x20] sm:$0xff] }
 0x122   : > { %2447 = vmatprep.subr.mxu0 %v1831_v60  ;;  %2532 = vmatpush3.msra.mxu1 %v1832_v8  ;;  %v2345_v36 = vld [vmem:[%s2734_s26 + $0x62] sm:$0xff] }
 0x123   : > { %v700_v53 = vpop.permute.xlu1 %699  ;;  %2448 = vmatpush3.msra.mxu0 %v1831_v60  ;;  %2517 = vmatprep.subr.mxu1 %v1831_v60 }
 0x124   : > { %796 = vst.msk [vmem:[#allocation2] sm:$0xff] %vm795_vm5, %v700_v53  ;;  %v702_v59 = vpop.permute.xlu0 %701  ;;  %2449 = vmatprep.subr.mxu0 %v1830_v24  ;;  %1697 = vrot.lane.b32.xlu0 %v2914_v56, %s2663_s25  ;;  %v2361_v53 = vld [vmem:[%s2734_s26 + $0x122] sm:$0xff] }
 0x125   : > { %1474 = vrot.lane.b32.xlu1 %v2754_v9, %s2662_s6  ;;  %797 = vst.msk [vmem:[#allocation2 + $0x8] sm:$0xff] %vm795_vm5, %v702_v59  ;;  %2533 = vmatpush3.msra.mxu1 %v1831_v60 }
 0x126   : > { %2450 = vmatpush3.msra.mxu0 %v1830_v24  ;;  %2518 = vmatprep.subr.mxu1 %v1830_v24 }
 0x127   : > { %v704_v62 = vpop.permute.xlu1 %703  ;;  %2451 = vmatprep.subr.mxu0 %v1829_v61  ;;  %2534 = vmatpush3.msra.mxu1 %v1830_v24 }
 0x128   : > { %798 = vst.msk [vmem:[#allocation2 + $0x10] sm:$0xff] %vm795_vm5, %v704_v62  ;;  %v706_v9 = vpop.permute.xlu0 %705  ;;  %2452 = vmatpush3.msra.mxu0 %v1829_v61  ;;  %1089 = vrot.lane.b32.xlu0 %v2864_v40, %s2660_s5 }
 0x129   : > { %1665 = vrot.lane.b32.xlu1 %v2864_v40, %s2663_s25  ;;  %799 = vst.msk [vmem:[#allocation2 + $0x18] sm:$0xff] %vm795_vm5, %v706_v9  ;;  %2519 = vmatprep.subr.mxu1 %v1829_v61  ;;  %v1826_v40 = vld [vmem:[%s3890_s1] sm:$0xff]  ;;  %v2346_v9 = vld [vmem:[%s2734_s26 + $0x6a] sm:$0xff] }
 0x12a   : > { %2453 = vmatprep.subr.mxu0 %v1828_v42  ;;  %2535 = vmatpush3.msra.mxu1 %v1829_v61 }
 0x12b   : > { %v708_v58 = vpop.permute.xlu1 %707  ;;  %2454 = vmatpush3.msra.mxu0 %v1828_v42  ;;  %2520 = vmatprep.subr.mxu1 %v1828_v42 }
 0x12c   : > { %800 = vst.msk [vmem:[#allocation2 + $0x20] sm:$0xff] %vm795_vm5, %v708_v58  ;;  %v710_v43 = vpop.permute.xlu0 %709  ;;  %2455 = vmatprep.subr.mxu0 %v1827_v51  ;;  %1667 = vrot.lane.b32.xlu0 %v2869_v41, %s2663_s25 }
 0x12d   : > { %930 = vrot.lane.b32.xlu1 %v2825_v25, %s2659_s30  ;;  %801 = vst.msk [vmem:[#allocation2 + $0x28] sm:$0xff] %vm795_vm5, %v710_v43  ;;  %2536 = vmatpush3.msra.mxu1 %v1828_v42  ;;  %v2591_v43 = vld [vmem:[%s2734_s26 + $0x12a] sm:$0xff] }
 0x12e   : > { %2456 = vmatpush3.msra.mxu0 %v1827_v51  ;;  %2521 = vmatprep.subr.mxu1 %v1827_v51 }
 0x12f   : > { %v712_v50 = vpop.permute.xlu1 %711  ;;  %2457 = vmatprep.subr.mxu0 %v1826_v40  ;;  %2537 = vmatpush3.msra.mxu1 %v1827_v51 }
 0x130   : > { %802 = vst.msk [vmem:[#allocation2 + $0x30] sm:$0xff] %vm795_vm5, %v712_v50  ;;  %v714_v25 = vpop.permute.xlu0 %713  ;;  %2458 = vmatpush3.msra.mxu0 %v1826_v40  ;;  %1091 = vrot.lane.b32.xlu0 %v2869_v41, %s2660_s5  ;;  %v2268_v50 = vld [vmem:[%s2734_s26 + $0x12a] sm:$0xff] }
 0x131   : > { %1121 = vrot.lane.b32.xlu1 %v2914_v56, %s2660_s5  ;;  %803 = vst.msk [vmem:[#allocation2 + $0x38] sm:$0xff] %vm795_vm5, %v714_v25  ;;  %2522 = vmatprep.subr.mxu1 %v1826_v40 }
 0x132   : > { %2538 = vmatpush3.msra.mxu1 %v1826_v40 }
 0x133   : > { %v716_v52 = vpop.permute.xlu1 %715 }
 0x134   : > { %804 = vst.msk [vmem:[#allocation2 + $0x40] sm:$0xff] %vm795_vm5, %v716_v52  ;;  %v718_v56 = vpop.permute.xlu0 %717  ;;  %1283 = vrot.lane.b32.xlu0 %v2956_v4, %s2661_s23 }
 0x135   : > { %1699 = vrot.lane.b32.xlu1 %v2919_v57, %s2663_s25  ;;  %805 = vst.msk [vmem:[#allocation2 + $0x48] sm:$0xff] %vm795_vm5, %v718_v56 }
 0x137   : > { %v720_v27 = vpop.permute.xlu1 %719 }
 0x138   : > { %806 = vst.msk [vmem:[#allocation2 + $0x50] sm:$0xff] %vm795_vm5, %v720_v27  ;;  %v722_v28 = vpop.permute.xlu0 %721  ;;  %1285 = vrot.lane.b32.xlu0 %v2959_v5, %s2661_s23  ;;  %v2312_v5 = vld [vmem:[%s2734_s26 + $0x51] sm:$0xff]  ;;  %v2315_v27 = vld [vmem:[%s2734_s26 + $0x79] sm:$0xff] }
 0x139   : > { %1123 = vrot.lane.b32.xlu1 %v2919_v57, %s2660_s5  ;;  %807 = vst.msk [vmem:[#allocation2 + $0x58] sm:$0xff] %vm795_vm5, %v722_v28  ;;  %v2311_v57 = vld [vmem:[%s2734_s26 + $0x49] sm:$0xff] }
 0x13b   : > { %v724_v6 = vpop.permute.xlu1 %723 }
 0x13c   : > { %808 = vst.msk [vmem:[#allocation2 + $0x60] sm:$0xff] %vm795_vm5, %v724_v6  ;;  %v726_v41 = vpop.permute.xlu0 %725  ;;  %1476 = vrot.lane.b32.xlu0 %v2311_v57, %s2662_s6  ;;  %v2316_v6 = vld [vmem:[%s2734_s26 + $0x81] sm:$0xff] }
 0x13d   : > { %1315 = vrot.lane.b32.xlu1 %v3004_v37, %s2661_s23  ;;  %809 = vst.msk [vmem:[#allocation2 + $0x68] sm:$0xff] %vm795_vm5, %v726_v41  ;;  %v2590_v37 = vld [vmem:[%s2734_s26 + $0x109] sm:$0xff]  ;;  %v2347_v57 = vld [vmem:[%s2734_s26 + $0x7a] sm:$0xff] }
 0x13f   : > { %v728_v7 = vpop.permute.xlu1 %727 }
 0x140   : > { %810 = vst.msk [vmem:[#allocation2 + $0x70] sm:$0xff] %vm795_vm5, %v728_v7  ;;  %v730_v4 = vpop.permute.xlu0 %729  ;;  %932 = vrot.lane.b32.xlu0 %v2590_v37, %s2659_s30 }
 0x141   : > { %1317 = vrot.lane.b32.xlu1 %v3007_v44, %s2661_s23  ;;  %811 = vst.msk [vmem:[#allocation2 + $0x78] sm:$0xff] %vm795_vm5, %v730_v4  ;;  %v2328_v44 = vld [vmem:[%s2734_s26 + $0x111] sm:$0xff] }
 0x143   : > { %v732_v29 = vpop.permute.xlu1 %731 }
 0x144   : > { %812 = vst.msk [vmem:[#allocation2 + $0x80] sm:$0xff] %vm795_vm5, %v732_v29  ;;  %v734_v30 = vpop.permute.xlu0 %733  ;;  %1510 = vrot.lane.b32.xlu0 %v2328_v44, %s2662_s6  ;;  %v2363_v29 = vld [vmem:[%s2734_s26 + $0x13a] sm:$0xff] }
 0x145   : > { %1508 = vrot.lane.b32.xlu1 %v2590_v37, %s2662_s6  ;;  %813 = vst.msk [vmem:[#allocation2 + $0x88] sm:$0xff] %vm795_vm5, %v734_v30 }
 0x147   : > { %v736_v10 = vpop.permute.xlu1 %735 }
 0x148   : > { %814 = vst.msk [vmem:[#allocation2 + $0x90] sm:$0xff] %vm795_vm5, %v736_v10  ;;  %v738_v11 = vpop.permute.xlu0 %737  ;;  %1701 = vrot.lane.b32.xlu0 %v3906_v16, %s2663_s25 }
 0x149   : > { %1478 = vrot.lane.b32.xlu1 %v2312_v5, %s2662_s6  ;;  %815 = vst.msk [vmem:[#allocation2 + $0x98] sm:$0xff] %vm795_vm5, %v738_v11 }
 0x14b   : > { %v740_v12 = vpop.permute.xlu1 %739 }
 0x14c   : > { %816 = vst.msk [vmem:[#allocation2 + $0xa0] sm:$0xff] %vm795_vm5, %v740_v12  ;;  %v742_v14 = vpop.permute.xlu0 %741  ;;  %1093 = vrot.lane.b32.xlu0 %v3905_v13, %s2660_s5  ;;  %v2364_v12 = vld [vmem:[%s2734_s26 + $0x142] sm:$0xff] }
 0x14d   : > { %1669 = vrot.lane.b32.xlu1 %v3905_v13, %s2663_s25  ;;  %817 = vst.msk [vmem:[#allocation2 + $0xa8] sm:$0xff] %vm795_vm5, %v742_v14 }
 0x14f   : > { %v744_v15 = vpop.permute.xlu1 %743 }
 0x150   : > { %818 = vst.msk [vmem:[#allocation2 + $0xb0] sm:$0xff] %vm795_vm5, %v744_v15  ;;  %v746_v17 = vpop.permute.xlu0 %745  ;;  %1671 = vrot.lane.b32.xlu0 %v3907_v31, %s2663_s25  ;;  %v2286_v31 = vld [vmem:[%s2734_s26 + $0x98] sm:$0xff] }
 0x151   : > { %934 = vrot.lane.b32.xlu1 %v2328_v44, %s2659_s30  ;;  %819 = vst.msk [vmem:[#allocation2 + $0xb8] sm:$0xff] %vm795_vm5, %v746_v17  ;;  %v2348_v44 = vld [vmem:[%s2734_s26 + $0x82] sm:$0xff]  ;;  %v2285_v17 = vld [vmem:[%s2734_s26 + $0x90] sm:$0xff] }
 0x153   : > { %v748_v18 = vpop.permute.xlu1 %747 }
 0x154   : > { %820 = vst.msk [vmem:[#allocation2 + $0xc0] sm:$0xff] %vm795_vm5, %v748_v18  ;;  %v750_v22 = vpop.permute.xlu0 %749  ;;  %1095 = vrot.lane.b32.xlu0 %v2250_v38, %s2660_s5 }
 0x155   : > { %1125 = vrot.lane.b32.xlu1 %v3906_v16, %s2660_s5  ;;  %821 = vst.msk [vmem:[#allocation2 + $0xc8] sm:$0xff] %vm795_vm5, %v750_v22 }
 0x157   : > { %v752_v23 = vpop.permute.xlu1 %751 }
 0x158   : > { %822 = vst.msk [vmem:[#allocation2 + $0xd0] sm:$0xff] %vm795_vm5, %v752_v23  ;;  %v754_v54 = vpop.permute.xlu0 %753  ;;  %1287 = vrot.lane.b32.xlu0 %v2962_v19, %s2661_s23 }
 0x159   : > { %1703 = vrot.lane.b32.xlu1 %v3908_v32, %s2663_s25  ;;  %823 = vst.msk [vmem:[#allocation2 + $0xd8] sm:$0xff] %vm795_vm5, %v754_v54 }
 0x15b   : > { %v756_v33 = vpop.permute.xlu1 %755 }
 0x15c   : > { %824 = vst.msk [vmem:[#allocation2 + $0xe0] sm:$0xff] %vm795_vm5, %v756_v33  ;;  %v758_v39 = vpop.permute.xlu0 %757  ;;  %1289 = vrot.lane.b32.xlu0 %v2965_v20, %s2661_s23  ;;  %v2317_v33 = vld [vmem:[%s2734_s26 + $0x91] sm:$0xff] }
 0x15d   : > { %1127 = vrot.lane.b32.xlu1 %v3908_v32, %s2660_s5  ;;  %825 = vst.msk [vmem:[#allocation2 + $0xe8] sm:$0xff] %vm795_vm5, %v758_v39  ;;  %v2302_v32 = vld [vmem:[%s2734_s26 + $0x158] sm:$0xff] }
 0x15f   : > { %v760_v55 = vpop.permute.xlu1 %759 }
 0x160   : > { %826 = vst.msk [vmem:[#allocation2 + $0xf0] sm:$0xff] %vm795_vm5, %v760_v55  ;;  %v762_v34 = vpop.permute.xlu0 %761  ;;  %1480 = vrot.lane.b32.xlu0 %v2313_v63, %s2662_s6 }
 0x161   : > { %1319 = vrot.lane.b32.xlu1 %v3010_v45, %s2661_s23  ;;  %827 = vst.msk [vmem:[#allocation2 + $0xf8] sm:$0xff] %vm795_vm5, %v762_v34  ;;  %v2329_v45 = vld [vmem:[%s2734_s26 + $0x121] sm:$0xff] }
 0x163   : > { %v893_v2 = vpop.permute.xlu1 %892 }
 0x164   : > { %989 = vst.msk [vmem:[#allocation2] sm:$0xff] %vm988_vm6, %v893_v2  ;;  %v895_v19 = vpop.permute.xlu0 %894  ;;  %936 = vrot.lane.b32.xlu0 %v2329_v45, %s2659_s30 }
 0x165   : > { %1321 = vrot.lane.b32.xlu1 %v3013_v46, %s2661_s23  ;;  %990 = vst.msk [vmem:[#allocation2 + $0x8] sm:$0xff] %vm988_vm6, %v895_v19  ;;  %v2330_v46 = vld [vmem:[%s2734_s26 + $0x129] sm:$0xff]  ;;  %v2318_v19 = vld [vmem:[%s2734_s26 + $0x99] sm:$0xff] }
 0x167   : > { %v897_v35 = vpop.permute.xlu1 %896 }
 0x168   : > { %991 = vst.msk [vmem:[#allocation2 + $0x10] sm:$0xff] %vm988_vm6, %v897_v35  ;;  %v899_v20 = vpop.permute.xlu0 %898  ;;  %1514 = vrot.lane.b32.xlu0 %v2330_v46, %s2662_s6  ;;  %v2334_v35 = vld [vmem:[%s2734_s26 + $0x159] sm:$0xff] }
 0x169   : > { %1512 = vrot.lane.b32.xlu1 %v2329_v45, %s2662_s6  ;;  %992 = vst.msk [vmem:[#allocation2 + $0x18] sm:$0xff] %vm988_vm6, %v899_v20 }
 0x16b   : > { %v901_v1 = vpop.permute.xlu1 %900 }
 0x16c   : > { %993 = vst.msk [vmem:[#allocation2 + $0x20] sm:$0xff] %vm988_vm6, %v901_v1  ;;  %v903_v3 = vpop.permute.xlu0 %902  ;;  %1705 = vrot.lane.b32.xlu0 %v2361_v53, %s2663_s25 }
 0x16d   : > { %1482 = vrot.lane.b32.xlu1 %v2314_v0, %s2662_s6  ;;  %994 = vst.msk [vmem:[#allocation2 + $0x28] sm:$0xff] %vm988_vm6, %v903_v3  ;;  %v2349_v0 = vld [vmem:[%s2734_s26 + $0x92] sm:$0xff] }
 0x16f   : > { %v905_v8 = vpop.permute.xlu1 %904 }
 0x170   : > { %995 = vst.msk [vmem:[#allocation2 + $0x30] sm:$0xff] %vm988_vm6, %v905_v8  ;;  %v907_v59 = vpop.permute.xlu0 %906  ;;  %1097 = vrot.lane.b32.xlu0 %v2345_v36, %s2660_s5 }
 0x171   : > { %1673 = vrot.lane.b32.xlu1 %v2345_v36, %s2663_s25  ;;  %996 = vst.msk [vmem:[#allocation2 + $0x38] sm:$0xff] %vm988_vm6, %v907_v59  ;;  %v2350_v59 = vld [vmem:[%s2734_s26 + $0x9a] sm:$0xff] }
 0x173   : > { %v909_v60 = vpop.permute.xlu1 %908 }
 0x174   : > { %997 = vst.msk [vmem:[#allocation2 + $0x40] sm:$0xff] %vm988_vm6, %v909_v60  ;;  %v911_v62 = vpop.permute.xlu0 %910  ;;  %1675 = vrot.lane.b32.xlu0 %v2346_v9, %s2663_s25 }
 0x175   : > { %938 = vrot.lane.b32.xlu1 %v2330_v46, %s2659_s30  ;;  %998 = vst.msk [vmem:[#allocation2 + $0x48] sm:$0xff] %vm988_vm6, %v911_v62  ;;  %v2365_v46 = vld [vmem:[%s2734_s26 + $0x152] sm:$0xff]  ;;  %v2366_v62 = vld [vmem:[%s2734_s26 + $0x15a] sm:$0xff] }
 0x177   : > { %v913_v24 = vpop.permute.xlu1 %912 }
 0x178   : > { %999 = vst.msk [vmem:[#allocation2 + $0x50] sm:$0xff] %vm988_vm6, %v913_v24  ;;  %v915_v61 = vpop.permute.xlu0 %914  ;;  %1099 = vrot.lane.b32.xlu0 %v2346_v9, %s2660_s5 }
 0x179   : > { %1129 = vrot.lane.b32.xlu1 %v2361_v53, %s2660_s5  ;;  %1000 = vst.msk [vmem:[#allocation2 + $0x58] sm:$0xff] %vm988_vm6, %v915_v61 }
 0x17b   : > { %v917_v58 = vpop.permute.xlu1 %916 }
 0x17c   : > { %1001 = vst.msk [vmem:[#allocation2 + $0x60] sm:$0xff] %vm988_vm6, %v917_v58  ;;  %v925_v42 = vpop.permute.xlu0 %924  ;;  %1291 = vrot.lane.b32.xlu0 %v2968_v21, %s2661_s23 }
 0x17d   : > { %1707 = vrot.lane.b32.xlu1 %v2591_v43, %s2663_s25  ;;  %1005 = vst.msk [vmem:[#allocation2 + $0x80] sm:$0xff] %vm988_vm6, %v925_v42  ;;  %v2287_v43 = vld [vmem:[%s2734_s26 + $0xa8] sm:$0xff] }
 0x17f   : > { %v927_v51 = vpop.permute.xlu1 %926 }
 0x180   : > { %1006 = vst.msk [vmem:[#allocation2 + $0x88] sm:$0xff] %vm988_vm6, %v927_v51  ;;  %v1086_v25 = vpop.permute.xlu0 %1085  ;;  %1293 = vrot.lane.b32.xlu0 %v2971_v26, %s2661_s23  ;;  %v2303_v51 = vld [vmem:[%s2734_s26 + $0x168] sm:$0xff] }
 0x181   : > { %1131 = vrot.lane.b32.xlu1 %v2268_v50, %s2660_s5  ;;  %1182 = vst.msk [vmem:[#allocation2] sm:$0xff] %vm1181_vm7, %v1086_v25 }
 0x183   : > { %v1118_v40 = vpop.permute.xlu1 %1117 }
 0x184   : > { %1198 = vst.msk [vmem:[#allocation2 + $0x80] sm:$0xff] %vm1181_vm7, %v1118_v40  ;;  %v1088_v52 = vpop.permute.xlu0 %1087  ;;  %1484 = vrot.lane.b32.xlu0 %v2315_v27, %s2662_s6  ;;  %v2288_v40 = vld [vmem:[%s2734_s26 + $0xb0] sm:$0xff] }
 0x185   : > { %1323 = vrot.lane.b32.xlu1 %v3018_v47, %s2661_s23  ;;  %1183 = vst.msk [vmem:[#allocation2 + $0x8] sm:$0xff] %vm1181_vm7, %v1088_v52  ;;  %v2331_v47 = vld [vmem:[%s2734_s26 + $0x139] sm:$0xff] }
 0x187   : > { %v1120_v56 = vpop.permute.xlu1 %1119 }
 0x188   : > { %1199 = vst.msk [vmem:[#allocation2 + $0x88] sm:$0xff] %vm1181_vm7, %v1120_v56  ;;  %v1280_v21 = vpop.permute.xlu0 %1279  ;;  %940 = vrot.lane.b32.xlu0 %v2331_v47, %s2659_s30  ;;  %v2304_v56 = vld [vmem:[%s2734_s26 + $0x170] sm:$0xff] }
 0x189   : > { %1325 = vrot.lane.b32.xlu1 %v3021_v48, %s2661_s23  ;;  %1376 = vst.msk [vmem:[#allocation2] sm:$0xff] %vm1375_vm8, %v1280_v21  ;;  %v2332_v48 = vld [vmem:[%s2734_s26 + $0x141] sm:$0xff]  ;;  %v2319_v21 = vld [vmem:[%s2734_s26 + $0xa9] sm:$0xff] }
 0x18b   : > { %v1312_v28 = vpop.permute.xlu1 %1311 }
 0x18c   : > { %1392 = vst.msk [vmem:[#allocation2 + $0x80] sm:$0xff] %vm1375_vm8, %v1312_v28  ;;  %v1282_v26 = vpop.permute.xlu0 %1281  ;;  %1518 = vrot.lane.b32.xlu0 %v2332_v48, %s2662_s6 }
 0x18d   : > { %1516 = vrot.lane.b32.xlu1 %v2331_v47, %s2662_s6  ;;  %1377 = vst.msk [vmem:[#allocation2 + $0x8] sm:$0xff] %vm1375_vm8, %v1282_v26  ;;  %v2335_v26 = vld [vmem:[%s2734_s26 + $0x169] sm:$0xff] }
 0x18f   : > { %v1314_v41 = vpop.permute.xlu1 %1313 }
 0x190   : > { %1393 = vst.msk [vmem:[#allocation2 + $0x88] sm:$0xff] %vm1375_vm8, %v1314_v41  ;;  %v1473_v7 = vpop.permute.xlu0 %1472  ;;  %1709 = vrot.lane.b32.xlu0 %v2363_v29, %s2663_s25 }
 0x191   : > { %1486 = vrot.lane.b32.xlu1 %v2316_v6, %s2662_s6  ;;  %1569 = vst.msk [vmem:[#allocation2] sm:$0xff] %vm1568_vm9, %v1473_v7  ;;  %v2320_v7 = vld [vmem:[%s2734_s26 + $0xb1] sm:$0xff] }
 0x193   : > { %v1505_v4 = vpop.permute.xlu1 %1504 }
 0x194   : > { %1585 = vst.msk [vmem:[#allocation2 + $0x80] sm:$0xff] %vm1568_vm9, %v1505_v4  ;;  %v929_v37 = vpop.permute.xlu0 %928  ;;  %1101 = vrot.lane.b32.xlu0 %v2347_v57, %s2660_s5  ;;  %v2336_v4 = vld [vmem:[%s2734_s26 + $0x171] sm:$0xff] }
 0x195   : > { %1677 = vrot.lane.b32.xlu1 %v2347_v57, %s2663_s25  ;;  %1007 = vst.msk [vmem:[#allocation2 + $0x90] sm:$0xff] %vm988_vm6, %v929_v37  ;;  %v2351_v37 = vld [vmem:[%s2734_s26 + $0xaa] sm:$0xff] }
 0x197   : > { %v1475_v30 = vpop.permute.xlu1 %1474 }
 0x198   : > { %1570 = vst.msk [vmem:[#allocation2 + $0x8] sm:$0xff] %vm1568_vm9, %v1475_v30  ;;  %v1507_v5 = vpop.permute.xlu0 %1506  ;;  %1679 = vrot.lane.b32.xlu0 %v2348_v44, %s2663_s25 }
 0x199   : > { %942 = vrot.lane.b32.xlu1 %v2332_v48, %s2659_s30  ;;  %1586 = vst.msk [vmem:[#allocation2 + $0x88] sm:$0xff] %vm1568_vm9, %v1507_v5  ;;  %v2367_v5 = vld [vmem:[%s2734_s26 + $0x16a] sm:$0xff] }
 0x19b   : > { %v1666_v10 = vpop.permute.xlu1 %1665 }
 0x19c   : > { %1762 = vst.msk [vmem:[#allocation2] sm:$0xff] %vm1761_vm10, %v1666_v10  ;;  %v1698_v11 = vpop.permute.xlu0 %1697  ;;  %1103 = vrot.lane.b32.xlu0 %v2348_v44, %s2660_s5 }
 0x19d   : > { %1133 = vrot.lane.b32.xlu1 %v2363_v29, %s2660_s5  ;;  %1778 = vst.msk [vmem:[#allocation2 + $0x80] sm:$0xff] %vm1761_vm10, %v1698_v11 }
 0x19f   : > { %v931_v13 = vpop.permute.xlu1 %930 }
 0x1a0   : > { %1008 = vst.msk [vmem:[#allocation2 + $0x98] sm:$0xff] %vm988_vm6, %v931_v13  ;;  %v1090_v14 = vpop.permute.xlu0 %1089  ;;  %1295 = vrot.lane.b32.xlu0 %v2285_v17, %s2661_s23 }
 0x1a1   : > { %1711 = vrot.lane.b32.xlu1 %v2364_v12, %s2663_s25  ;;  %1184 = vst.msk [vmem:[#allocation2 + $0x10] sm:$0xff] %vm1181_vm7, %v1090_v14  ;;  %v2352_v14 = vld [vmem:[%s2734_s26 + $0xb2] sm:$0xff] }
 0x1a3   : > { %v1122_v15 = vpop.permute.xlu1 %1121  ;;  %v1794_v16 = vld [vmem:[#allocation2] sm:$0xff] }
 0x1a4   : > { %1200 = vst.msk [vmem:[#allocation2 + $0x90] sm:$0xff] %vm1181_vm7, %v1122_v15  ;;  %2459 = vmatprep.mubr.f32.mxu0 %v1794_v16  ;;  %v1668_v18 = vpop.permute.xlu0 %1667  ;;  %v1810_v22 = vld [vmem:[#allocation2 + $0x80] sm:$0xff]  ;;  %1297 = vrot.lane.b32.xlu0 %v2286_v31, %s2661_s23  ;;  %v2368_v16 = vld [vmem:[%s2734_s26 + $0x172] sm:$0xff] }
 0x1a5   : > { %1135 = vrot.lane.b32.xlu1 %v2364_v12, %s2660_s5  ;;  %1763 = vst.msk [vmem:[#allocation2 + $0x8] sm:$0xff] %vm1761_vm10, %v1668_v18  ;;  %2483 = vmatprep.mubr.f32.mxu1 %v1810_v22 }
 0x1a7   : > { %v1700_v23 = vpop.permute.xlu1 %1699 }
 0x1a8   : > { %1779 = vst.msk [vmem:[#allocation2 + $0x88] sm:$0xff] %vm1761_vm10, %v1700_v23  ;;  %v1092_v38 = vpop.permute.xlu0 %1091  ;;  %1488 = vrot.lane.b32.xlu0 %v2317_v33, %s2662_s6 }
 0x1a9   : > { %1327 = vrot.lane.b32.xlu1 %v3024_v49, %s2661_s23  ;;  %1185 = vst.msk [vmem:[#allocation2 + $0x18] sm:$0xff] %vm1181_vm7, %v1092_v38  ;;  %v2333_v49 = vld [vmem:[%s2734_s26 + $0x151] sm:$0xff]  ;;  %v2289_v38 = vld [vmem:[%s2734_s26 + $0xc0] sm:$0xff] }
 0x1ab   : > { %v1124_v54 = vpop.permute.xlu1 %1123 }
 0x1ac   : > { %1201 = vst.msk [vmem:[#allocation2 + $0x98] sm:$0xff] %vm1181_vm7, %v1124_v54  ;;  %v1284_v39 = vpop.permute.xlu0 %1283  ;;  %v1795_v55 = vld [vmem:[#allocation2 + $0x8] sm:$0xff]  ;;  %944 = vrot.lane.b32.xlu0 %v2333_v49, %s2659_s30  ;;  %v2305_v54 = vld [vmem:[%s2734_s26 + $0x180] sm:$0xff] }
 0x1ad   : > { %1329 = vrot.lane.b32.xlu1 %v2302_v32, %s2661_s23  ;;  %1378 = vst.msk [vmem:[#allocation2 + $0x10] sm:$0xff] %vm1375_vm8, %v1284_v39  ;;  %2460 = vmatmul.mubr.f32.vlgmr.msra.gmra.mxu0 %v1795_v55  ;;  %v2290_v39 = vld [vmem:[%s2734_s26 + $0xc8] sm:$0xff] }
 0x1af   : > { %v1316_v34 = vpop.permute.xlu1 %1315  ;;  %v1811_v2 = vld [vmem:[#allocation2 + $0x88] sm:$0xff] }
 0x1b0   : > { %1394 = vst.msk [vmem:[#allocation2 + $0x90] sm:$0xff] %vm1375_vm8, %v1316_v34  ;;  %2484 = vmatmul.mubr.f32.vlgmr.msra.gmra.mxu1 %v1811_v2  ;;  %v1286_v63 = vpop.permute.xlu0 %1285  ;;  %1522 = vrot.lane.b32.xlu0 %v2334_v35, %s2662_s6 }
 0x1b1   : > { %1520 = vrot.lane.b32.xlu1 %v2333_v49, %s2662_s6  ;;  %1379 = vst.msk [vmem:[#allocation2 + $0x18] sm:$0xff] %vm1375_vm8, %v1286_v63  ;;  %v2306_v49 = vld [vmem:[%s2734_s26 + $0x188] sm:$0xff] }
 0x1b2   : > { %v2321_v63 = vld [vmem:[%s2734_s26 + $0xc1] sm:$0xff] }
 0x1b3   : > { %v1318_v45 = vpop.permute.xlu1 %1317 }
 0x1b4   : > { %1395 = vst.msk [vmem:[#allocation2 + $0x98] sm:$0xff] %vm1375_vm8, %v1318_v45  ;;  %v1477_v20 = vpop.permute.xlu0 %1476  ;;  %1713 = vrot.lane.b32.xlu0 %v2365_v46, %s2663_s25 }
 0x1b5   : > { %1490 = vrot.lane.b32.xlu1 %v2318_v19, %s2662_s6  ;;  %1571 = vst.msk [vmem:[#allocation2 + $0x10] sm:$0xff] %vm1568_vm9, %v1477_v20 }
 0x1b7   : > { %v1509_v1 = vpop.permute.xlu1 %1508 }
 0x1b8   : > { %1587 = vst.msk [vmem:[#allocation2 + $0x90] sm:$0xff] %vm1568_vm9, %v1509_v1  ;;  %v933_v3 = vpop.permute.xlu0 %932  ;;  %1105 = vrot.lane.b32.xlu0 %v2349_v0, %s2660_s5 }
 0x1b9   : > { %1681 = vrot.lane.b32.xlu1 %v2349_v0, %s2663_s25  ;;  %1009 = vst.msk [vmem:[#allocation2 + $0xa0] sm:$0xff] %vm988_vm6, %v933_v3 }
 0x1bb   : > { %v1479_v36 = vpop.permute.xlu1 %1478 }
 0x1bc   : > { %1572 = vst.msk [vmem:[#allocation2 + $0x18] sm:$0xff] %vm1568_vm9, %v1479_v36  ;;  %v1511_v8 = vpop.permute.xlu0 %1510  ;;  %1683 = vrot.lane.b32.xlu0 %v2350_v59, %s2663_s25  ;;  %v2338_v36 = vld [vmem:[%s2734_s26 + $0x189] sm:$0xff] }
 0x1bd   : > { %946 = vrot.lane.b32.xlu1 %v2334_v35, %s2659_s30  ;;  %1588 = vst.msk [vmem:[#allocation2 + $0x98] sm:$0xff] %vm1568_vm9, %v1511_v8  ;;  %v2337_v35 = vld [vmem:[%s2734_s26 + $0x181] sm:$0xff] }
 0x1bf   : > { %v1670_v53 = vpop.permute.xlu1 %1669 }
 0x1c0   : > { %1764 = vst.msk [vmem:[#allocation2 + $0x10] sm:$0xff] %vm1761_vm10, %v1670_v53  ;;  %v1702_v60 = vpop.permute.xlu0 %1701  ;;  %1107 = vrot.lane.b32.xlu0 %v2350_v59, %s2660_s5  ;;  %v2353_v53 = vld [vmem:[%s2734_s26 + $0xc2] sm:$0xff] }
 0x1c1   : > { %1137 = vrot.lane.b32.xlu1 %v2365_v46, %s2660_s5  ;;  %1780 = vst.msk [vmem:[#allocation2 + $0x90] sm:$0xff] %vm1761_vm10, %v1702_v60  ;;  %v2322_v46 = vld [vmem:[%s2734_s26 + $0xc9] sm:$0xff] }
 0x1c2   : > { %v2369_v60 = vld [vmem:[%s2734_s26 + $0x182] sm:$0xff] }
 0x1c3   : > { %v935_v24 = vpop.permute.xlu1 %934 }
 0x1c4   : > { %1010 = vst.msk [vmem:[#allocation2 + $0xa8] sm:$0xff] %vm988_vm6, %v935_v24  ;;  %v1094_v9 = vpop.permute.xlu0 %1093  ;;  %1299 = vrot.lane.b32.xlu0 %v2287_v43, %s2661_s23  ;;  %v2354_v43 = vld [vmem:[%s2734_s26 + $0xca] sm:$0xff] }
 0x1c5   : > { %1715 = vrot.lane.b32.xlu1 %v2366_v62, %s2663_s25  ;;  %1186 = vst.msk [vmem:[#allocation2 + $0x20] sm:$0xff] %vm1181_vm7, %v1094_v9 }
 0x1c7   : > { %v1126_v61 = vpop.permute.xlu1 %1125  ;;  %v1796_v58 = vld [vmem:[#allocation2 + $0x10] sm:$0xff] }
 0x1c8   : > { %1202 = vst.msk [vmem:[#allocation2 + $0xa0] sm:$0xff] %vm1181_vm7, %v1126_v61  ;;  %2462 = vmatprep.mubr.f32.mxu0 %v1796_v58  ;;  %v1672_v42 = vpop.permute.xlu0 %1671  ;;  %v1812_v50 = vld [vmem:[#allocation2 + $0x90] sm:$0xff]  ;;  %1301 = vrot.lane.b32.xlu0 %v2288_v40, %s2661_s23 }
 0x1c9   : > { %1139 = vrot.lane.b32.xlu1 %v2366_v62, %s2660_s5  ;;  %1765 = vst.msk [vmem:[#allocation2 + $0x18] sm:$0xff] %vm1761_vm10, %v1672_v42  ;;  %2486 = vmatprep.mubr.f32.mxu1 %v1812_v50 }
 0x1cb   : > { %v1704_v25 = vpop.permute.xlu1 %1703 }
 0x1cc   : > { %1781 = vst.msk [vmem:[#allocation2 + $0x98] sm:$0xff] %vm1761_vm10, %v1704_v25  ;;  %v1096_v52 = vpop.permute.xlu0 %1095  ;;  %1492 = vrot.lane.b32.xlu0 %v2319_v21, %s2662_s6 }
 0x1cd   : > { %1331 = vrot.lane.b32.xlu1 %v2303_v51, %s2661_s23  ;;  %1187 = vst.msk [vmem:[#allocation2 + $0x28] sm:$0xff] %vm1181_vm7, %v1096_v52  ;;  %v2370_v51 = vld [vmem:[%s2734_s26 + $0x18a] sm:$0xff] }
 0x1cf   : > { %v1128_v27 = vpop.permute.xlu1 %1127 }
 0x1d0   : > { %1203 = vst.msk [vmem:[#allocation2 + $0xa8] sm:$0xff] %vm1181_vm7, %v1128_v27  ;;  %v1288_v47 = vpop.permute.xlu0 %1287  ;;  %v1797_v28 = vld [vmem:[#allocation2 + $0x18] sm:$0xff]  ;;  %948 = vrot.lane.b32.xlu0 %v2335_v26, %s2659_s30 }
 0x1d1   : > { %1333 = vrot.lane.b32.xlu1 %v2304_v56, %s2661_s23  ;;  %1380 = vst.msk [vmem:[#allocation2 + $0x20] sm:$0xff] %vm1375_vm8, %v1288_v47  ;;  %2463 = vmatmul.mubr.f32.gmra.mxu0 %v1797_v28  ;;  %v2291_v27 = vld [vmem:[%s2734_s26 + $0xd8] sm:$0xff] }
 0x1d2   : > { %v2307_v47 = vld [vmem:[%s2734_s26 + $0x198] sm:$0xff] }
 0x1d3   : > { %v1320_v6 = vpop.permute.xlu1 %1319  ;;  %v1813_v41 = vld [vmem:[#allocation2 + $0x98] sm:$0xff] }
 0x1d4   : > { %1396 = vst.msk [vmem:[#allocation2 + $0xa0] sm:$0xff] %vm1375_vm8, %v1320_v6  ;;  %2487 = vmatmul.mubr.f32.gmra.mxu1 %v1813_v41  ;;  %v1290_v48 = vpop.permute.xlu0 %1289  ;;  %1526 = vrot.lane.b32.xlu0 %v2336_v4, %s2662_s6  ;;  %v2292_v6 = vld [vmem:[%s2734_s26 + $0xe0] sm:$0xff] }
 0x1d5   : > { %1524 = vrot.lane.b32.xlu1 %v2335_v26, %s2662_s6  ;;  %1381 = vst.msk [vmem:[#allocation2 + $0x28] sm:$0xff] %vm1375_vm8, %v1290_v48 }
 0x1d7   : > { %v1322_v57 = vpop.permute.xlu1 %1321 }
 0x1d8   : > { %1397 = vst.msk [vmem:[#allocation2 + $0xa8] sm:$0xff] %vm1375_vm8, %v1322_v57  ;;  %v1481_v29 = vpop.permute.xlu0 %1480  ;;  %1717 = vrot.lane.b32.xlu0 %v2367_v5, %s2663_s25 }
 0x1d9   : > { %1494 = vrot.lane.b32.xlu1 %v2320_v7, %s2662_s6  ;;  %1573 = vst.msk [vmem:[#allocation2 + $0x20] sm:$0xff] %vm1568_vm9, %v1481_v29 }
 0x1db   : > { %v1513_v30 = vpop.permute.xlu1 %1512 }
 0x1dc   : > { %1589 = vst.msk [vmem:[#allocation2 + $0xa0] sm:$0xff] %vm1568_vm9, %v1513_v30  ;;  %v937_v10 = vpop.permute.xlu0 %936  ;;  %950 = vrot.lane.b32.xlu0 %v2336_v4, %s2659_s30  ;;  %v2323_v4 = vld [vmem:[%s2734_s26 + $0xd9] sm:$0xff] }
 0x1dd   : > { %1685 = vrot.lane.b32.xlu1 %v2351_v37, %s2663_s25  ;;  %1011 = vst.msk [vmem:[#allocation2 + $0xb0] sm:$0xff] %vm988_vm6, %v937_v10 }
 0x1df   : > { %v1483_v44 = vpop.permute.xlu1 %1482 }
 0x1e0   : > { %1574 = vst.msk [vmem:[#allocation2 + $0x28] sm:$0xff] %vm1568_vm9, %v1483_v44  ;;  %v1515_v11 = vpop.permute.xlu0 %1514  ;;  %1141 = vrot.lane.b32.xlu0 %v2367_v5, %s2660_s5  ;;  %v2324_v5 = vld [vmem:[%s2734_s26 + $0xe1] sm:$0xff] }
 0x1e1   : > { %918 = vrot.lane.b32.xlu1 %v2320_v7, %s2659_s30  ;;  %1590 = vst.msk [vmem:[#allocation2 + $0xa8] sm:$0xff] %vm1568_vm9, %v1515_v11  ;;  %v2308_v7 = vld [vmem:[%s2734_s26 + $0x1a0] sm:$0xff] }
 0x1e2   : > { %v2340_v44 = vld [vmem:[%s2734_s26 + $0x1a1] sm:$0xff] }
 0x1e3   : > { %v1674_v12 = vpop.permute.xlu1 %1673 }
 0x1e4   : > { %1766 = vst.msk [vmem:[#allocation2 + $0x20] sm:$0xff] %vm1761_vm10, %v1674_v12  ;;  %v1706_v13 = vpop.permute.xlu0 %1705  ;;  %1719 = vrot.lane.b32.xlu0 %v2368_v16, %s2663_s25  ;;  %v2355_v12 = vld [vmem:[%s2734_s26 + $0xda] sm:$0xff] }
 0x1e5   : > { %1109 = vrot.lane.b32.xlu1 %v2351_v37, %s2660_s5  ;;  %1782 = vst.msk [vmem:[#allocation2 + $0xa0] sm:$0xff] %vm1761_vm10, %v1706_v13  ;;  %v2339_v37 = vld [vmem:[%s2734_s26 + $0x199] sm:$0xff] }
 0x1e7   : > { %v939_v15 = vpop.permute.xlu1 %938 }
 0x1e8   : > { %1012 = vst.msk [vmem:[#allocation2 + $0xb8] sm:$0xff] %vm988_vm6, %v939_v15  ;;  %v1098_v17 = vpop.permute.xlu0 %1097  ;;  %1143 = vrot.lane.b32.xlu0 %v2368_v16, %s2660_s5  ;;  %v2356_v16 = vld [vmem:[%s2734_s26 + $0xe2] sm:$0xff] }
 0x1e9   : > { %1687 = vrot.lane.b32.xlu1 %v2352_v14, %s2663_s25  ;;  %1188 = vst.msk [vmem:[#allocation2 + $0x30] sm:$0xff] %vm1181_vm7, %v1098_v17 }
 0x1eb   : > { %v1130_v18 = vpop.permute.xlu1 %1129  ;;  %v1798_v22 = vld [vmem:[#allocation2 + $0x20] sm:$0xff] }
 0x1ec   : > { %1204 = vst.msk [vmem:[#allocation2 + $0xb0] sm:$0xff] %vm1181_vm7, %v1130_v18  ;;  %2465 = vmatprep.mubr.f32.mxu0 %v1798_v22  ;;  %v1676_v23 = vpop.permute.xlu0 %1675  ;;  %v1814_v31 = vld [vmem:[#allocation2 + $0xa0] sm:$0xff]  ;;  %1335 = vrot.lane.b32.xlu0 %v2305_v54, %s2661_s23 }
 0x1ed   : > { %1111 = vrot.lane.b32.xlu1 %v2352_v14, %s2660_s5  ;;  %1767 = vst.msk [vmem:[#allocation2 + $0x28] sm:$0xff] %vm1761_vm10, %v1676_v23  ;;  %2489 = vmatprep.mubr.f32.mxu1 %v1814_v31  ;;  %v2371_v14 = vld [vmem:[%s2734_s26 + $0x19a] sm:$0xff]  ;;  %v2372_v18 = vld [vmem:[%s2734_s26 + $0x1a2] sm:$0xff]  ;;  %s134_s26 = sand.u32 1, %s2644_s10  }
 0x1ef   : > { %v1708_v32 = vpop.permute.xlu1 %1707 }
 0x1f0   : > { %1783 = vst.msk [vmem:[#allocation2 + $0xa8] sm:$0xff] %vm1761_vm10, %v1708_v32  ;;  %v1100_v33 = vpop.permute.xlu0 %1099  ;;  %1337 = vrot.lane.b32.xlu0 %v2306_v49, %s2661_s23 }
 0x1f1   : > { %1303 = vrot.lane.b32.xlu1 %v2289_v38, %s2661_s23  ;;  %1189 = vst.msk [vmem:[#allocation2 + $0x38] sm:$0xff] %vm1181_vm7, %v1100_v33 }
 0x1f3   : > { %v1132_v55 = vpop.permute.xlu1 %1131 }
 0x1f4   : > { %1205 = vst.msk [vmem:[#allocation2 + $0xb8] sm:$0xff] %vm1181_vm7, %v1132_v55  ;;  %v1292_v34 = vpop.permute.xlu0 %1291  ;;  %v1799_v2 = vld [vmem:[#allocation2 + $0x28] sm:$0xff]  ;;  %1528 = vrot.lane.b32.xlu0 %v2337_v35, %s2662_s6 }
 0x1f5   : > { %1305 = vrot.lane.b32.xlu1 %v2290_v39, %s2661_s23  ;;  %1382 = vst.msk [vmem:[#allocation2 + $0x30] sm:$0xff] %vm1375_vm8, %v1292_v34  ;;  %2466 = vmatmul.mubr.f32.gmra.mxu0 %v1799_v2 }
 0x1f7   : > { %v1324_v19 = vpop.permute.xlu1 %1323  ;;  %v1815_v45 = vld [vmem:[#allocation2 + $0xa8] sm:$0xff] }
 0x1f8   : > { %1398 = vst.msk [vmem:[#allocation2 + $0xb0] sm:$0xff] %vm1375_vm8, %v1324_v19  ;;  %2490 = vmatmul.mubr.f32.gmra.mxu1 %v1815_v45  ;;  %v1294_v20 = vpop.permute.xlu0 %1293  ;;  %952 = vrot.lane.b32.xlu0 %v2337_v35, %s2659_s30 }
 0x1f9   : > { %1496 = vrot.lane.b32.xlu1 %v2321_v63, %s2662_s6  ;;  %1383 = vst.msk [vmem:[#allocation2 + $0x38] sm:$0xff] %vm1375_vm8, %v1294_v20 }
 0x1fb   : > { %v1326_v0 = vpop.permute.xlu1 %1325 }
 0x1fc   : > { %1399 = vst.msk [vmem:[#allocation2 + $0xb8] sm:$0xff] %vm1375_vm8, %v1326_v0  ;;  %v1485_v1 = vpop.permute.xlu0 %1484  ;;  %1530 = vrot.lane.b32.xlu0 %v2338_v36, %s2662_s6 }
 0x1fd   : > { %920 = vrot.lane.b32.xlu1 %v2321_v63, %s2659_s30  ;;  %1575 = vst.msk [vmem:[#allocation2 + $0x30] sm:$0xff] %vm1568_vm9, %v1485_v1 }
 0x1ff   : > { %v1517_v3 = vpop.permute.xlu1 %1516 }
 0x200   : > { %1591 = vst.msk [vmem:[#allocation2 + $0xb0] sm:$0xff] %vm1568_vm9, %v1517_v3  ;;  %v941_v8 = vpop.permute.xlu0 %940  ;;  %1721 = vrot.lane.b32.xlu0 %v2369_v60, %s2663_s25 }
 0x201   : > { %1498 = vrot.lane.b32.xlu1 %v2322_v46, %s2662_s6  ;;  %1013 = vst.msk [vmem:[#allocation2 + $0xc0] sm:$0xff] %vm988_vm6, %v941_v8 }
 0x203   : > { %v1487_v59 = vpop.permute.xlu1 %1486 }
 0x204   : > { %1576 = vst.msk [vmem:[#allocation2 + $0x38] sm:$0xff] %vm1568_vm9, %v1487_v59  ;;  %v1519_v62 = vpop.permute.xlu0 %1518  ;;  %954 = vrot.lane.b32.xlu0 %v2338_v36, %s2659_s30 }
 0x205   : > { %1689 = vrot.lane.b32.xlu1 %v2353_v53, %s2663_s25  ;;  %1592 = vst.msk [vmem:[#allocation2 + $0xb8] sm:$0xff] %vm1568_vm9, %v1519_v62 }
 0x207   : > { %v1678_v24 = vpop.permute.xlu1 %1677 }
 0x208   : > { %1768 = vst.msk [vmem:[#allocation2 + $0x30] sm:$0xff] %vm1761_vm10, %v1678_v24  ;;  %v1710_v9 = vpop.permute.xlu0 %1709  ;;  %1145 = vrot.lane.b32.xlu0 %v2369_v60, %s2660_s5 }
 0x209   : > { %922 = vrot.lane.b32.xlu1 %v2322_v46, %s2659_s30  ;;  %1784 = vst.msk [vmem:[#allocation2 + $0xb0] sm:$0xff] %vm1761_vm10, %v1710_v9  ;;  %s2179_s30 = sshll.u32 %s134_s26, 8 }
 0x20b   : > { %v943_v61 = vpop.permute.xlu1 %942 }
 0x20c   : > { %1014 = vst.msk [vmem:[#allocation2 + $0xc8] sm:$0xff] %vm988_vm6, %v943_v61  ;;  %v1102_v58 = vpop.permute.xlu0 %1101  ;;  %1723 = vrot.lane.b32.xlu0 %v2370_v51, %s2663_s25 }
 0x20d   : > { %1113 = vrot.lane.b32.xlu1 %v2353_v53, %s2660_s5  ;;  %1190 = vst.msk [vmem:[#allocation2 + $0x40] sm:$0xff] %vm1181_vm7, %v1102_v58 }
 0x20f   : > { %v1134_v42 = vpop.permute.xlu1 %1133  ;;  %v1800_v50 = vld [vmem:[#allocation2 + $0x30] sm:$0xff] }
 0x210   : > { %1206 = vst.msk [vmem:[#allocation2 + $0xc0] sm:$0xff] %vm1181_vm7, %v1134_v42  ;;  %2468 = vmatprep.mubr.f32.mxu0 %v1800_v50  ;;  %v1680_v25 = vpop.permute.xlu0 %1679  ;;  %v1816_v40 = vld [vmem:[#allocation2 + $0xb0] sm:$0xff]  ;;  %1147 = vrot.lane.b32.xlu0 %v2370_v51, %s2660_s5 }
 0x211   : > { %1691 = vrot.lane.b32.xlu1 %v2354_v43, %s2663_s25  ;;  %1769 = vst.msk [vmem:[#allocation2 + $0x38] sm:$0xff] %vm1761_vm10, %v1680_v25  ;;  %2492 = vmatprep.mubr.f32.mxu1 %v1816_v40 }
 0x213   : > { %v1712_v52 = vpop.permute.xlu1 %1711 }
 0x214   : > { %1785 = vst.msk [vmem:[#allocation2 + $0xb8] sm:$0xff] %vm1761_vm10, %v1712_v52  ;;  %v1104_v56 = vpop.permute.xlu0 %1103  ;;  %1339 = vrot.lane.b32.xlu0 %v2307_v47, %s2661_s23 }
 0x215   : > { %1115 = vrot.lane.b32.xlu1 %v2354_v43, %s2660_s5  ;;  %1191 = vst.msk [vmem:[#allocation2 + $0x48] sm:$0xff] %vm1181_vm7, %v1104_v56  ;;  %s3777_s5 = scalar_lea.vmem [#allocation3], %s2179_s30 }
 0x217   : > { %v1136_v21 = vpop.permute.xlu1 %1135 }
 0x218   : > { %1207 = vst.msk [vmem:[#allocation2 + $0xc8] sm:$0xff] %vm1181_vm7, %v1136_v21  ;;  %v1296_v28 = vpop.permute.xlu0 %1295  ;;  %v1801_v26 = vld [vmem:[#allocation2 + $0x38] sm:$0xff]  ;;  %1341 = vrot.lane.b32.xlu0 %v2308_v7, %s2661_s23 }
 0x219   : > { %1307 = vrot.lane.b32.xlu1 %v2291_v27, %s2661_s23  ;;  %1384 = vst.msk [vmem:[#allocation2 + $0x40] sm:$0xff] %vm1375_vm8, %v1296_v28  ;;  %2469 = vmatmul.mubr.f32.gmra.mxu0 %v1801_v26 }
 0x21b   : > { %v1328_v41 = vpop.permute.xlu1 %1327  ;;  %v1817_v48 = vld [vmem:[#allocation2 + $0xb8] sm:$0xff] }
 0x21c   : > { %1400 = vst.msk [vmem:[#allocation2 + $0xc0] sm:$0xff] %vm1375_vm8, %v1328_v41  ;;  %2493 = vmatmul.mubr.f32.gmra.mxu1 %v1817_v48  ;;  %v1298_v57 = vpop.permute.xlu0 %1297  ;;  %1532 = vrot.lane.b32.xlu0 %v2339_v37, %s2662_s6 }
 0x21d   : > { %1309 = vrot.lane.b32.xlu1 %v2292_v6, %s2661_s23  ;;  %1385 = vst.msk [vmem:[#allocation2 + $0x48] sm:$0xff] %vm1375_vm8, %v1298_v57  ;;  %s2378_s23 = sshll.u32 %s2702_s13, 12  ;;  %s3848_s13 = scalar_lea.sflag [#allocation4], %s134_s26 }
 0x21e   : > { %s3839_s22 = scalar_lea.hbm %s3891_s2, %s2378_s23 }
 0x21f   : > { %v1330_v29 = vpop.permute.xlu1 %1329 }
 0x220   : > { %1401 = vst.msk [vmem:[#allocation2 + $0xc8] sm:$0xff] %vm1375_vm8, %v1330_v29  ;;  %v1489_v30 = vpop.permute.xlu0 %1488  ;;  %1534 = vrot.lane.b32.xlu0 %v2340_v44, %s2662_s6 }
 0x221   : > { %1500 = vrot.lane.b32.xlu1 %v2323_v4, %s2662_s6  ;;  %1577 = vst.msk [vmem:[#allocation2 + $0x40] sm:$0xff] %vm1568_vm9, %v1489_v30 }
 0x223   : > { %v1521_v10 = vpop.permute.xlu1 %1520 }
 0x224   : > { %1593 = vst.msk [vmem:[#allocation2 + $0xc0] sm:$0xff] %vm1568_vm9, %v1521_v10  ;;  %v945_v11 = vpop.permute.xlu0 %944  ;;  %1725 = vrot.lane.b32.xlu0 %v2371_v14, %s2663_s25 }
 0x225   : > { %1502 = vrot.lane.b32.xlu1 %v2324_v5, %s2662_s6  ;;  %1015 = vst.msk [vmem:[#allocation2 + $0xd0] sm:$0xff] %vm988_vm6, %v945_v11  ;;  %s2113_s6 = sshll.u32 %s3777_s5, 4  ;;  %s3843_s6 = int_to_ptr.vmem [resolvable:$true] %s2113_s6 }
 0x226   : > { %s2592_s24 = scalar_lea.vmem %s3843_s6, 4096 }
 0x227   : > { %v1491_v13 = vpop.permute.xlu1 %1490  ;;  %p2593_p11 = scmp.ne.s32.totalorder %s3843_s6, %s2592_s24 }
 0x228   : > { %1578 = vst.msk [vmem:[#allocation2 + $0x48] sm:$0xff] %vm1568_vm9, %v1491_v13  ;;  %v1523_v15 = vpop.permute.xlu0 %1522  ;;  %1727 = vrot.lane.b32.xlu0 %v2372_v18, %s2663_s25 }
 0x229   : > { %1693 = vrot.lane.b32.xlu1 %v2355_v12, %s2663_s25  ;;  %1594 = vst.msk [vmem:[#allocation2 + $0xc8] sm:$0xff] %vm1568_vm9, %v1523_v15  ;;  %p2594_p12 = pnand %p2593_p11, %p2719_p5 }
 0x22b   : > { %v1682_v17 = vpop.permute.xlu1 %1681  ;;  %p2595_p13 = pneg %p2594_p12 }
 0x22c   : > { %1770 = vst.msk [vmem:[#allocation2 + $0x40] sm:$0xff] %vm1761_vm10, %v1682_v17  ;;  %v1714_v22 = vpop.permute.xlu0 %1713 }
 0x22d   : > { %1695 = vrot.lane.b32.xlu1 %v2356_v16, %s2663_s25  ;;  %1786 = vst.msk [vmem:[#allocation2 + $0xc0] sm:$0xff] %vm1761_vm10, %v1714_v22  ;;  %s2664_s25 = smov [#allocation3]  }
 0x22e   : > { %s2596_s27 = sshll.u32 %s2664_s25, 4  ;;  %s2597_s27 = int_to_ptr.vmem [resolvable:$false] %s2596_s27 }
 0x22f   : > { %v947_v23 = vpop.permute.xlu1 %946  ;;  %s2598_s29 = scalar_lea.vmem %s2597_s27, 8192  ;;  %p2599_p0 = scmp.lt.s32.totalorder %s3843_s6, %s2597_s27 }
 0x230   : > { %1016 = vst.msk [vmem:[#allocation2 + $0xd8] sm:$0xff] %vm988_vm6, %v947_v23  ;;  %v1106_v31 = vpop.permute.xlu0 %1105  ;;  %p2600_p1 = scmp.lt.s32.totalorder %s2598_s29, %s2592_s24 }
 0x231   : > { %1192 = vst.msk [vmem:[#allocation2 + $0x50] sm:$0xff] %vm1181_vm7, %v1106_v31 }
 0x232   : > { %p2601_p2 = por %p2600_p1, %p2599_p0 }
 0x233   : > { %v1138_v38 = vpop.permute.xlu1 %1137  ;;  %v1802_v32 = vld [vmem:[#allocation2 + $0x40] sm:$0xff] }
 0x234   : > { %1208 = vst.msk [vmem:[#allocation2 + $0xd0] sm:$0xff] %vm1181_vm7, %v1138_v38  ;;  %2471 = vmatprep.mubr.f32.mxu0 %v1802_v32  ;;  %v1684_v54 = vpop.permute.xlu0 %1683  ;;  %v1818_v33 = vld [vmem:[#allocation2 + $0xc0] sm:$0xff]  ;;  %p2602_p3 = pnand %p2601_p2, %p2595_p13 }
 0x235   : > { %1771 = vst.msk [vmem:[#allocation2 + $0x48] sm:$0xff] %vm1761_vm10, %v1684_v54  ;;  %2495 = vmatprep.mubr.f32.mxu1 %v1818_v33 }
 0x237   : > { %v1716_v39 = vpop.permute.xlu1 %1715 }
 0x238   : > { %1787 = vst.msk [vmem:[#allocation2 + $0xc8] sm:$0xff] %vm1761_vm10, %v1716_v39  ;;  %v1108_v55 = vpop.permute.xlu0 %1107 }
 0x239   : > { %1193 = vst.msk [vmem:[#allocation2 + $0x58] sm:$0xff] %vm1181_vm7, %v1108_v55 }
 0x23b   : > { %v1140_v49 = vpop.permute.xlu1 %1139 }
 0x23c   : > { %1209 = vst.msk [vmem:[#allocation2 + $0xd8] sm:$0xff] %vm1181_vm7, %v1140_v49  ;;  %v1300_v34 = vpop.permute.xlu0 %1299  ;;  %v1803_v2 = vld [vmem:[#allocation2 + $0x48] sm:$0xff] }
 0x23d   : > { %1386 = vst.msk [vmem:[#allocation2 + $0x50] sm:$0xff] %vm1375_vm8, %v1300_v34  ;;  %2472 = vmatmul.mubr.f32.gmra.mxu0 %v1803_v2 }
 0x23f   : > { %v1332_v63 = vpop.permute.xlu1 %1331  ;;  %v1819_v19 = vld [vmem:[#allocation2 + $0xc8] sm:$0xff] }
 0x240   : > { %1402 = vst.msk [vmem:[#allocation2 + $0xd0] sm:$0xff] %vm1375_vm8, %v1332_v63  ;;  %2496 = vmatmul.mubr.f32.gmra.mxu1 %v1819_v19  ;;  %v1302_v45 = vpop.permute.xlu0 %1301 }
 0x241   : > { %1387 = vst.msk [vmem:[#allocation2 + $0x58] sm:$0xff] %vm1375_vm8, %v1302_v45 }
 0x243   : > { %v1334_v35 = vpop.permute.xlu1 %1333 }
 0x244   : > { %1403 = vst.msk [vmem:[#allocation2 + $0xd8] sm:$0xff] %vm1375_vm8, %v1334_v35  ;;  %v1493_v20 = vpop.permute.xlu0 %1492 }
 0x245   : > { %1579 = vst.msk [vmem:[#allocation2 + $0x50] sm:$0xff] %vm1568_vm9, %v1493_v20 }
 0x247   : > { %v1525_v0 = vpop.permute.xlu1 %1524 }
 0x248   : > { %1595 = vst.msk [vmem:[#allocation2 + $0xd0] sm:$0xff] %vm1568_vm9, %v1525_v0  ;;  %v949_v1 = vpop.permute.xlu0 %948 }
 0x249   : > { %1017 = vst.msk [vmem:[#allocation2 + $0xe0] sm:$0xff] %vm988_vm6, %v949_v1 }
 0x24b   : > { %v1495_v46 = vpop.permute.xlu1 %1494 }
 0x24c   : > { %1580 = vst.msk [vmem:[#allocation2 + $0x58] sm:$0xff] %vm1568_vm9, %v1495_v46  ;;  %v1527_v3 = vpop.permute.xlu0 %1526 }
 0x24d   : > { %1596 = vst.msk [vmem:[#allocation2 + $0xd8] sm:$0xff] %vm1568_vm9, %v1527_v3 }
 0x24f   : > { %v1686_v36 = vpop.permute.xlu1 %1685 }
 0x250   : > { %1772 = vst.msk [vmem:[#allocation2 + $0x50] sm:$0xff] %vm1761_vm10, %v1686_v36  ;;  %v1718_v8 = vpop.permute.xlu0 %1717 }
 0x251   : > { %1788 = vst.msk [vmem:[#allocation2 + $0xd0] sm:$0xff] %vm1761_vm10, %v1718_v8 }
 0x253   : > { %v919_v53 = vpop.permute.xlu1 %918 }
 0x254   : > { %1002 = vst.msk [vmem:[#allocation2 + $0x68] sm:$0xff] %vm988_vm6, %v919_v53  ;;  %v951_v59 = vpop.permute.xlu0 %950 }
 0x255   : > { %1018 = vst.msk [vmem:[#allocation2 + $0xe8] sm:$0xff] %vm988_vm6, %v951_v59 }
 0x257   : > { %v1110_v60 = vpop.permute.xlu1 %1109  ;;  %v1804_v62 = vld [vmem:[#allocation2 + $0x50] sm:$0xff] }
 0x258   : > { %1194 = vst.msk [vmem:[#allocation2 + $0x60] sm:$0xff] %vm1181_vm7, %v1110_v60  ;;  %2474 = vmatprep.mubr.f32.mxu0 %v1804_v62  ;;  %v1142_v24 = vpop.permute.xlu0 %1141  ;;  %v1820_v9 = vld [vmem:[#allocation2 + $0xd0] sm:$0xff] }
 0x259   : > { %1210 = vst.msk [vmem:[#allocation2 + $0xe0] sm:$0xff] %vm1181_vm7, %v1142_v24  ;;  %2498 = vmatprep.mubr.f32.mxu1 %v1820_v9 }
 0x25b   : > { %v1688_v61 = vpop.permute.xlu1 %1687 }
 0x25c   : > { %1773 = vst.msk [vmem:[#allocation2 + $0x58] sm:$0xff] %vm1761_vm10, %v1688_v61  ;;  %v1720_v58 = vpop.permute.xlu0 %1719 }
 0x25d   : > { %1789 = vst.msk [vmem:[#allocation2 + $0xd8] sm:$0xff] %vm1761_vm10, %v1720_v58 }
 0x25f   : > { %v1112_v43 = vpop.permute.xlu1 %1111 }
 0x260   : > { %1195 = vst.msk [vmem:[#allocation2 + $0x68] sm:$0xff] %vm1181_vm7, %v1112_v43  ;;  %v1144_v42 = vpop.permute.xlu0 %1143 }
 0x261   : > { %1211 = vst.msk [vmem:[#allocation2 + $0xe8] sm:$0xff] %vm1181_vm7, %v1144_v42 }
 0x263   : > { %v1304_v50 = vpop.permute.xlu1 %1303  ;;  %v1805_v51 = vld [vmem:[#allocation2 + $0x58] sm:$0xff] }
 0x264   : > { %1388 = vst.msk [vmem:[#allocation2 + $0x60] sm:$0xff] %vm1375_vm8, %v1304_v50  ;;  %2475 = vmatmul.mubr.f32.gmra.mxu0 %v1805_v51  ;;  %v1336_v25 = vpop.permute.xlu0 %1335  ;;  %v1821_v40 = vld [vmem:[#allocation2 + $0xd8] sm:$0xff] }
 0x265   : > { %1404 = vst.msk [vmem:[#allocation2 + $0xe0] sm:$0xff] %vm1375_vm8, %v1336_v25  ;;  %2499 = vmatmul.mubr.f32.gmra.mxu1 %v1821_v40 }
 0x267   : > { %v1306_v52 = vpop.permute.xlu1 %1305 }
 0x268   : > { %1389 = vst.msk [vmem:[#allocation2 + $0x68] sm:$0xff] %vm1375_vm8, %v1306_v52  ;;  %v1338_v56 = vpop.permute.xlu0 %1337 }
 0x269   : > { %1405 = vst.msk [vmem:[#allocation2 + $0xe8] sm:$0xff] %vm1375_vm8, %v1338_v56 }
 0x26b   : > { %v1497_v27 = vpop.permute.xlu1 %1496 }
 0x26c   : > { %1581 = vst.msk [vmem:[#allocation2 + $0x60] sm:$0xff] %vm1568_vm9, %v1497_v27  ;;  %v1529_v21 = vpop.permute.xlu0 %1528 }
 0x26d   : > { %1597 = vst.msk [vmem:[#allocation2 + $0xe0] sm:$0xff] %vm1568_vm9, %v1529_v21  ;;  %v2461_v47 = vpop.f32.mrf.mxu0 }
 0x26e   : > { %2068 = vst [vmem:[%s3777_s5 + $0x8] sm:$0xff] %v2461_v47 }
 0x26f   : > { %v921_v28 = vpop.permute.xlu1 %920  ;;  %v1908_v26 = vpop.f32.mrf.mxu0 }
 0x270   : > { %1003 = vst.msk [vmem:[#allocation2 + $0x70] sm:$0xff] %vm988_vm6, %v921_v28  ;;  %v2485_v6 = vpop.f32.mrf.mxu1  ;;  %2067 = vst [vmem:[%s3777_s5] sm:$0xff] %v1908_v26  ;;  %v953_v41 = vpop.permute.xlu0 %952 }
 0x271   : > { %2084 = vst [vmem:[%s3777_s5 + $0x88] sm:$0xff] %v2485_v6  ;;  %1019 = vst.msk [vmem:[#allocation2 + $0xf0] sm:$0xff] %vm988_vm6, %v953_v41 }
 0x272   : > { %v1988_v48 = vpop.f32.mrf.mxu1 }
 0x273   : > { %2083 = vst [vmem:[%s3777_s5 + $0x80] sm:$0xff] %v1988_v48  ;;  %v1499_v7 = vpop.permute.xlu1 %1498 }
 0x274   : > { %1582 = vst.msk [vmem:[#allocation2 + $0x68] sm:$0xff] %vm1568_vm9, %v1499_v7  ;;  %v1531_v57 = vpop.permute.xlu0 %1530 }
 0x275   : > { %1598 = vst.msk [vmem:[#allocation2 + $0xe8] sm:$0xff] %vm1568_vm9, %v1531_v57 }
 0x277   : > { %v1690_v4 = vpop.permute.xlu1 %1689 }
 0x278   : > { %1774 = vst.msk [vmem:[#allocation2 + $0x60] sm:$0xff] %vm1761_vm10, %v1690_v4  ;;  %v1722_v29 = vpop.permute.xlu0 %1721 }
 0x279   : > { %1790 = vst.msk [vmem:[#allocation2 + $0xe0] sm:$0xff] %vm1761_vm10, %v1722_v29 }
 0x27b   : > { %v923_v37 = vpop.permute.xlu1 %922 }
 0x27c   : > { %1004 = vst.msk [vmem:[#allocation2 + $0x78] sm:$0xff] %vm988_vm6, %v923_v37  ;;  %v955_v30 = vpop.permute.xlu0 %954 }
 0x27d   : > { %1020 = vst.msk [vmem:[#allocation2 + $0xf8] sm:$0xff] %vm988_vm6, %v955_v30 }
 0x27f   : > { %v1114_v5 = vpop.permute.xlu1 %1113  ;;  %v1806_v10 = vld [vmem:[#allocation2 + $0x60] sm:$0xff] }
 0x280   : > { %1196 = vst.msk [vmem:[#allocation2 + $0x70] sm:$0xff] %vm1181_vm7, %v1114_v5  ;;  %2477 = vmatprep.mubr.f32.mxu0 %v1806_v10  ;;  %v1146_v44 = vpop.permute.xlu0 %1145  ;;  %v1822_v11 = vld [vmem:[#allocation2 + $0xe0] sm:$0xff] }
 0x281   : > { %1212 = vst.msk [vmem:[#allocation2 + $0xf0] sm:$0xff] %vm1181_vm7, %v1146_v44  ;;  %2501 = vmatprep.mubr.f32.mxu1 %v1822_v11 }
 0x283   : > { %v1692_v12 = vpop.permute.xlu1 %1691 }
 0x284   : > { %1775 = vst.msk [vmem:[#allocation2 + $0x68] sm:$0xff] %vm1761_vm10, %v1692_v12  ;;  %v1724_v13 = vpop.permute.xlu0 %1723 }
 0x285   : > { %1791 = vst.msk [vmem:[#allocation2 + $0xe8] sm:$0xff] %vm1761_vm10, %v1724_v13 }
 0x287   : > { %v1116_v14 = vpop.permute.xlu1 %1115 }
 0x288   : > { %1197 = vst.msk [vmem:[#allocation2 + $0x78] sm:$0xff] %vm1181_vm7, %v1116_v14  ;;  %v1148_v15 = vpop.permute.xlu0 %1147 }
 0x289   : > { %1213 = vst.msk [vmem:[#allocation2 + $0xf8] sm:$0xff] %vm1181_vm7, %v1148_v15 }
 0x28b   : > { %v1308_v16 = vpop.permute.xlu1 %1307  ;;  %v1807_v17 = vld [vmem:[#allocation2 + $0x68] sm:$0xff] }
 0x28c   : > { %1390 = vst.msk [vmem:[#allocation2 + $0x70] sm:$0xff] %vm1375_vm8, %v1308_v16  ;;  %2478 = vmatmul.mubr.f32.gmra.mxu0 %v1807_v17  ;;  %v1340_v18 = vpop.permute.xlu0 %1339  ;;  %v1823_v22 = vld [vmem:[#allocation2 + $0xe8] sm:$0xff] }
 0x28d   : > { %1406 = vst.msk [vmem:[#allocation2 + $0xf0] sm:$0xff] %vm1375_vm8, %v1340_v18  ;;  %2502 = vmatmul.mubr.f32.gmra.mxu1 %v1823_v22 }
 0x28f   : > { %v1310_v23 = vpop.permute.xlu1 %1309 }
 0x290   : > { %1391 = vst.msk [vmem:[#allocation2 + $0x78] sm:$0xff] %vm1375_vm8, %v1310_v23  ;;  %v1342_v31 = vpop.permute.xlu0 %1341 }
 0x291   : > { %1407 = vst.msk [vmem:[#allocation2 + $0xf8] sm:$0xff] %vm1375_vm8, %v1342_v31  ;;  %v2464_v38 = vpop.f32.mrf.mxu0 }
 0x292   : > { %2070 = vst [vmem:[%s3777_s5 + $0x18] sm:$0xff] %v2464_v38 }
 0x293   : > { %v1501_v32 = vpop.permute.xlu1 %1500  ;;  %v1918_v54 = vpop.f32.mrf.mxu0 }
 0x294   : > { %1583 = vst.msk [vmem:[#allocation2 + $0x70] sm:$0xff] %vm1568_vm9, %v1501_v32  ;;  %v2488_v33 = vpop.f32.mrf.mxu1  ;;  %2069 = vst [vmem:[%s3777_s5 + $0x10] sm:$0xff] %v1918_v54  ;;  %v1533_v39 = vpop.permute.xlu0 %1532 }
 0x295   : > { %2086 = vst [vmem:[%s3777_s5 + $0x98] sm:$0xff] %v2488_v33  ;;  %1599 = vst.msk [vmem:[#allocation2 + $0xf0] sm:$0xff] %vm1568_vm9, %v1533_v39 }
 0x296   : > { %v1998_v55 = vpop.f32.mrf.mxu1 }
 0x297   : > { %2085 = vst [vmem:[%s3777_s5 + $0x90] sm:$0xff] %v1998_v55  ;;  %v1503_v49 = vpop.permute.xlu1 %1502 }
 0x298   : > { %1584 = vst.msk [vmem:[#allocation2 + $0x78] sm:$0xff] %vm1568_vm9, %v1503_v49  ;;  %v1535_v34 = vpop.permute.xlu0 %1534 }
 0x299   : > { %1600 = vst.msk [vmem:[#allocation2 + $0xf8] sm:$0xff] %vm1568_vm9, %v1535_v34 }
 0x29b   : > { %v1694_v2 = vpop.permute.xlu1 %1693 }
 0x29c   : > { %1776 = vst.msk [vmem:[#allocation2 + $0x70] sm:$0xff] %vm1761_vm10, %v1694_v2  ;;  %v1726_v63 = vpop.permute.xlu0 %1725 }
 0x29d   : > { %1792 = vst.msk [vmem:[#allocation2 + $0xf0] sm:$0xff] %vm1761_vm10, %v1726_v63 }
 0x29f   : > { %v1696_v19 = vpop.permute.xlu1 %1695 }
 0x2a0   : > { %1777 = vst.msk [vmem:[#allocation2 + $0x78] sm:$0xff] %vm1761_vm10, %v1696_v19  ;;  %v1728_v45 = vpop.permute.xlu0 %1727 }
 0x2a1   : > { %1793 = vst.msk [vmem:[#allocation2 + $0xf8] sm:$0xff] %vm1761_vm10, %v1728_v45 }
 0x2a3   : > { %v1808_v35 = vld [vmem:[#allocation2 + $0x70] sm:$0xff] }
 0x2a4   : > { %2480 = vmatprep.mubr.f32.mxu0 %v1808_v35  ;;  %v1824_v20 = vld [vmem:[#allocation2 + $0xf0] sm:$0xff] }
 0x2a5   : > { %2504 = vmatprep.mubr.f32.mxu1 %v1824_v20 }
 0x2a7   : > { %v1809_v0 = vld [vmem:[#allocation2 + $0x78] sm:$0xff] }
 0x2a8   : > { %2481 = vmatmul.mubr.f32.gmra.mxu0 %v1809_v0  ;;  %v1825_v1 = vld [vmem:[#allocation2 + $0xf8] sm:$0xff] }
 0x2a9   : > { %2505 = vmatmul.mubr.f32.gmra.mxu1 %v1825_v1 }
 0x2b5   : > { %v2467_v46 = vpop.f32.mrf.mxu0 }
 0x2b6   : > { %2072 = vst [vmem:[%s3777_s5 + $0x28] sm:$0xff] %v2467_v46 }
 0x2b7   : > { %v1928_v3 = vpop.f32.mrf.mxu0 }
 0x2b8   : > { %v2491_v36 = vpop.f32.mrf.mxu1  ;;  %2071 = vst [vmem:[%s3777_s5 + $0x20] sm:$0xff] %v1928_v3 }
 0x2b9   : > { %2088 = vst [vmem:[%s3777_s5 + $0xa8] sm:$0xff] %v2491_v36 }
 0x2ba   : > { %v2008_v8 = vpop.f32.mrf.mxu1 }
 0x2bb   : > { %2087 = vst [vmem:[%s3777_s5 + $0xa0] sm:$0xff] %v2008_v8 }
 0x2d9   : > { %v2470_v53 = vpop.f32.mrf.mxu0 }
 0x2da   : > { %2074 = vst [vmem:[%s3777_s5 + $0x38] sm:$0xff] %v2470_v53 }
 0x2db   : > { %v1938_v59 = vpop.f32.mrf.mxu0 }
 0x2dc   : > { %v2494_v60 = vpop.f32.mrf.mxu1  ;;  %2073 = vst [vmem:[%s3777_s5 + $0x30] sm:$0xff] %v1938_v59 }
 0x2dd   : > { %2090 = vst [vmem:[%s3777_s5 + $0xb8] sm:$0xff] %v2494_v60 }
 0x2de   : > { %v2018_v62 = vpop.f32.mrf.mxu1 }
 0x2df   : > { %2089 = vst [vmem:[%s3777_s5 + $0xb0] sm:$0xff] %v2018_v62 }
 0x2fd   : > { %v2473_v24 = vpop.f32.mrf.mxu0 }
 0x2fe   : > { %2076 = vst [vmem:[%s3777_s5 + $0x48] sm:$0xff] %v2473_v24 }
 0x2ff   : > { %v1948_v9 = vpop.f32.mrf.mxu0 }
 0x300   : > { %v2497_v61 = vpop.f32.mrf.mxu1  ;;  %2075 = vst [vmem:[%s3777_s5 + $0x40] sm:$0xff] %v1948_v9 }
 0x301   : > { %2092 = vst [vmem:[%s3777_s5 + $0xc8] sm:$0xff] %v2497_v61 }
 0x302   : > { %v2028_v58 = vpop.f32.mrf.mxu1 }
 0x303   : > { %2091 = vst [vmem:[%s3777_s5 + $0xc0] sm:$0xff] %v2028_v58 }
 0x324   : > { %v2476_v43 = vpop.f32.mrf.mxu0 }
 0x325   : > { %2078 = vst [vmem:[%s3777_s5 + $0x58] sm:$0xff] %v2476_v43  ;;  %v2500_v50 = vpop.f32.mrf.mxu1 }
 0x326   : > { %v1958_v42 = vpop.f32.mrf.mxu0  ;;  %2094 = vst [vmem:[%s3777_s5 + $0xd8] sm:$0xff] %v2500_v50 }
 0x327   : > { %2077 = vst [vmem:[%s3777_s5 + $0x50] sm:$0xff] %v1958_v42  ;;  %v2038_v51 = vpop.f32.mrf.mxu1 }
 0x328   : > { %2093 = vst [vmem:[%s3777_s5 + $0xd0] sm:$0xff] %v2038_v51 }
 0x34c   : > { %v2479_v25 = vpop.f32.mrf.mxu0 }
 0x34d   : > { %2080 = vst [vmem:[%s3777_s5 + $0x68] sm:$0xff] %v2479_v25  ;;  %v2503_v52 = vpop.f32.mrf.mxu1 }
 0x34e   : > { %v1968_v40 = vpop.f32.mrf.mxu0  ;;  %2096 = vst [vmem:[%s3777_s5 + $0xe8] sm:$0xff] %v2503_v52 }
 0x34f   : > { %2079 = vst [vmem:[%s3777_s5 + $0x60] sm:$0xff] %v1968_v40  ;;  %v2048_v56 = vpop.f32.mrf.mxu1 }
 0x350   : > { %2095 = vst [vmem:[%s3777_s5 + $0xe0] sm:$0xff] %v2048_v56 }
 0x368   : > { %v2482_v27 = vpop.f32.mrf.mxu0 }
 0x369   : > { %2082 = vst [vmem:[%s3777_s5 + $0x78] sm:$0xff] %v2482_v27  ;;  %v2506_v47 = vpop.f32.mrf.mxu1 }
 0x36a   : > { %v1978_v21 = vpop.f32.mrf.mxu0  ;;  %2098 = vst [vmem:[%s3777_s5 + $0xf8] sm:$0xff] %v2506_v47 }
 0x36b   : > { %2081 = vst [vmem:[%s3777_s5 + $0x70] sm:$0xff] %v1978_v21  ;;  %v2058_v28 = vpop.f32.mrf.mxu1 }
 0x36c   : > { %2097 = vst [vmem:[%s3777_s5 + $0xf0] sm:$0xff] %v2058_v28 }
 0x36d   : > { %2605 = shalt.err (!%p2602_p3)
}
 0x36e   : > { %s2606_s3 = scalar_lea.hbm %s3839_s22, 4096  ;;  %s2610_s8 = scalar_lea.hbm %s3891_s2, 8192 }
 0x36f   : > { %p2607_p4 = scmp.ne.s32.totalorder %s3839_s22, %s2606_s3  ;;  %p2611_p9 = scmp.lt.s32.totalorder %s3839_s22, %s3891_s2 }
 0x370   : > { %p2612_p10 = scmp.lt.s32.totalorder %s2610_s8, %s2606_s3 }
 0x371   : > { %p2608_p7 = pnand %p2607_p4, %p2719_p5 }
 0x372   : > { %p2613_p11 = por %p2612_p10, %p2611_p9 }
 0x373   : > { %p2609_p8 = pneg %p2608_p7 }
 0x375   : > { %p2614_p12 = pnand %p2613_p11, %p2609_p8 }
 0x377   : > { %2617 = shalt.err (!%p2614_p12)
}
 0x378   : > { %s2665_s26 = smov 128  }
 0x379   : > { %2540 = dma.vmem_to_hbm [thread:$0]  (%p2719_p5), %s3843_s6, 4096, %s3839_s22, %s3848_s13, %s2665_s26, %s2665_s26, %s2657_s28  }
 0x37a PF: > { %p2546_p13 = scmp.ge.s32.totalorder %s2652_s12, 2  ;;  %s2128_s30 = sand.u32 1, %s2640_s9  }
 0x37b   : > { %s2129_s5 = scalar_lea.sflag [#allocation4], %s2128_s30 }
 0x37c   : > { %p2543_p0 = pnand %p2546_p13, %p2723_p6 }
 0x37e   : > { %p2544_p1 = pneg %p2543_p0 }
 0x380   : > { %2635 = dma.done.wait (%p2544_p1), %s2129_s5, 4096  }
 0x381   : > { %2637 = vsyncadd (%p2544_p1), %s2129_s5, 4294963200  ;;  %p12_p2 = scmp.ge.s32.totalorder %s2706_s15, 4   ;;  %s3909_s9 = smov %s2644_s10 }
 0x382   : > { %s3910_s10 = smov %s2648_s11  ;;  %s3911_s11 = smov %s2717_s18 }
 0x383   : > { %s3912_s12 = smov %s2706_s15  ;;  %14 = sbr.rel (!%p12_p2) target bundleno = 3 (0x3), region = 65 }
 0x388   :  { %2134 = vsyncpa [#allocation4], 1 }
 0x389   :  { %2136 = vsyncpa [#allocation4 + $0x1], 1 }

</bundles_post_ra>
